<compile_context>
chip_gen: v7x
topology: tpu7x:2x2x1
jax: 0.10.0
libtpu: 0.0.40
codegen_flags: <defaults>
</compile_context>

<pallas_src>
import jax
import jax.numpy as jnp
from jax.experimental import pallas as pl
from jax.experimental.pallas import tpu as pltpu

WDTYPE = jnp.bfloat16   # matmul operand dtype (f32 accumulation)


# -----------------------------------------------------------------------------
# Shared in-kernel GRU cell (PyTorch nn.GRU gate equations, fused gate weights)
# -----------------------------------------------------------------------------
def _gru_gates(x, h, wx_ref, wh_ref, bx_ref, bh_ref):
    """x: [B, E] f32, h: [B, H] f32, wx: [E, 3H], wh: [H, 3H] (r|z|n)."""
    H = h.shape[-1]
    gx = jnp.dot(x.astype(WDTYPE), wx_ref[...],
                 preferred_element_type=jnp.float32) + bx_ref[...]
    gh = jnp.dot(h.astype(WDTYPE), wh_ref[...],
                 preferred_element_type=jnp.float32) + bh_ref[...]
    r = jax.nn.sigmoid(gx[:, 0 * H:1 * H] + gh[:, 0 * H:1 * H])
    z = jax.nn.sigmoid(gx[:, 1 * H:2 * H] + gh[:, 1 * H:2 * H])
    n = jnp.tanh(gx[:, 2 * H:3 * H] + r * gh[:, 2 * H:3 * H])
    return (1.0 - z) * n + z * h


# -----------------------------------------------------------------------------
# Fused GRU encoder: grid over time, h carried in VMEM scratch, weights resident
# -----------------------------------------------------------------------------
def _encoder_kernel(emb_ref, wx_ref, wh_ref, bx_ref, bh_ref, ctx_ref, h_scr):
    t = pl.program_id(0)

    @pl.when(t == 0)
    def _():
        h_scr[...] = jnp.zeros_like(h_scr)

    h_new = _gru_gates(emb_ref[0], h_scr[...], wx_ref, wh_ref, bx_ref, bh_ref)
    h_scr[...] = h_new
    ctx_ref[0] = h_new


def sequence_mask(lengths, max_len):
    # [B, max_len] bool, True where position < length (OpenNMT sequence_mask).
    return jnp.arange(max_len)[None, :] < lengths[:, None]


def run_gru_encoder(emb, lengths, p):
    """emb: [T, B, E], lengths: [B] -> (contexts [T, B, H], final hidden [B, H]).
    Mimics pack_padded_sequence: padded positions produce zero contexts, the
    final hidden is the hidden at each sequence's last valid step."""
    T, B, E = emb.shape
    H = p["wh"].shape[0]
    ctx = pl.pallas_call(
        _encoder_kernel,
        out_shape=jax.ShapeDtypeStruct((T, B, H), jnp.float32),
        grid=(T,),
        in_specs=[
            pl.BlockSpec((1, B, E), lambda t: (t, 0, 0)),      # per-step slice
            pl.BlockSpec((E, 3 * H), lambda t: (0, 0)),        # resident weights
            pl.BlockSpec((H, 3 * H), lambda t: (0, 0)),
            pl.BlockSpec((1, 3 * H), lambda t: (0, 0)),
            pl.BlockSpec((1, 3 * H), lambda t: (0, 0)),
        ],
        out_specs=pl.BlockSpec((1, B, H), lambda t: (t, 0, 0)),
        scratch_shapes=[pltpu.VMEM((B, H), jnp.float32)],
        compiler_params=pltpu.CompilerParams(
            dimension_semantics=("arbitrary",)),
    )(emb, p["wx"], p["wh"], p["bx"], p["bh"])

    mask = sequence_mask(lengths, T)                               # [B, T]
    ctx = ctx * mask.T[:, :, None].astype(ctx.dtype)               # zero pads
    idx = jnp.clip(lengths - 1, 0, T - 1)                          # [B]
    h_final = ctx[idx, jnp.arange(B)]                              # [B, H]
    return ctx, h_final


# -----------------------------------------------------------------------------
# Fused attentional decoder step: GRU + ref attention + src attention + out proj
# -----------------------------------------------------------------------------
def _decoder_kernel(emb_ref, h0_ref, wx_ref, wh_ref, bx_ref, bh_ref,
                    ref_ctx_ref, ref_mask_ref, src_ctx_ref, src_mask_ref,
                    wc_ref, bc_ref, out_ref, attn_ref, h_scr):
    t = pl.program_id(0)

    @pl.when(t == 0)
    def _():
        h_scr[...] = h0_ref[...]

    h_new = _gru_gates(emb_ref[0], h_scr[...], wx_ref, wh_ref, bx_ref, bh_ref)
    h_scr[...] = h_new

    def attend(ctx, mask):
        # Luong dot attention on the VPU/XLU (B is tiny -> no MXU push for matvecs).
        scores = jnp.sum(h_new[:, None, :] * ctx, axis=-1)          # [B, T]
        scores = jnp.where(mask > 0.5, scores, -1e9)
        m = jnp.max(scores, axis=-1, keepdims=True)
        e = jnp.exp(scores - m)
        a = e * pl.reciprocal(jnp.sum(e, axis=-1, keepdims=True), approx=True)
        c = jnp.sum(a[:, :, None] * ctx, axis=1)                    # [B, H]
        return a, c

    a_ref_w, c_ref = attend(ref_ctx_ref[...], ref_mask_ref[...])
    _, c_src = attend(src_ctx_ref[...], src_mask_ref[...])

    # output = tanh([c_ref; c_src; h] @ Wc + b) with Wc pre-sliced (no concat needed)
    H = h_new.shape[-1]
    out = jnp.tanh(
        jnp.dot(c_ref.astype(WDTYPE), wc_ref[0 * H:1 * H],
                preferred_element_type=jnp.float32)
        + jnp.dot(c_src.astype(WDTYPE), wc_ref[1 * H:2 * H],
                  preferred_element_type=jnp.float32)
        + jnp.dot(h_new.astype(WDTYPE), wc_ref[2 * H:3 * H],
                  preferred_element_type=jnp.float32)
        + bc_ref[...])
    out_ref[0] = out
    attn_ref[0] = a_ref_w


def decode(emb_tgt, ref_ctx, ref_mask, src_ctx, src_mask, h0, dec_p, wc, bc):
    """Attentional GRU decoder. Returns (dec_outputs [Ttgt,B,H], attn [Ttgt,B,Tref])."""
    T, B, E = emb_tgt.shape
    H = h0.shape[-1]
    ref_ctx_bth = jnp.transpose(ref_ctx, (1, 0, 2))                # [B, Tref, H]
    src_ctx_bth = jnp.transpose(src_ctx, (1, 0, 2))                # [B, Tsrc, H]
    Tref = ref_ctx_bth.shape[1]
    Tsrc = src_ctx_bth.shape[1]
    ref_mask_f = ref_mask.astype(jnp.float32)
    src_mask_f = src_mask.astype(jnp.float32)

    def resident(shape):
        return pl.BlockSpec(shape, lambda t, _n=len(shape): (0,) * _n)

    dec_outputs, attn = pl.pallas_call(
        _decoder_kernel,
        out_shape=(jax.ShapeDtypeStruct((T, B, H), jnp.float32),
                   jax.ShapeDtypeStruct((T, B, Tref), jnp.float32)),
        grid=(T,),
        in_specs=[
            pl.BlockSpec((1, B, E), lambda t: (t, 0, 0)),  # per-step target emb
            resident((B, H)),                              # h0
            resident((E, 3 * H)),                          # decoder GRU Wx
            resident((H, 3 * H)),                          # decoder GRU Wh
            resident((1, 3 * H)),                          # bx
            resident((1, 3 * H)),                          # bh
            resident((B, Tref, H)),                        # ref contexts
            resident((B, Tref)),                           # ref mask
            resident((B, Tsrc, H)),                        # src contexts
            resident((B, Tsrc)),                           # src mask
            resident((3 * H, H)),                          # Wc
            resident((1, H)),                              # bc
        ],
        out_specs=(pl.BlockSpec((1, B, H), lambda t: (t, 0, 0)),
                   pl.BlockSpec((1, B, Tref), lambda t: (t, 0, 0))),
        scratch_shapes=[pltpu.VMEM((B, H), jnp.float32)],
        compiler_params=pltpu.CompilerParams(
            dimension_semantics=("arbitrary",)),
    )(emb_tgt, h0, dec_p["wx"], dec_p["wh"], dec_p["bx"], dec_p["bh"],
      ref_ctx_bth, ref_mask_f, src_ctx_bth, src_mask_f, wc, bc)
    return dec_outputs, attn


# -----------------------------------------------------------------------------
# Model glue (plain JAX)
# -----------------------------------------------------------------------------
def response_generator_forward(params, src_inputs, tgt_inputs,
                               template_inputs, src_lengths, template_lengths,
                               ev=None):
    # ---- encode ----
    emb_src = params["enc_embedding"][src_inputs]                   # [Tsrc,B,E]
    src_contexts, enc_hidden = run_gru_encoder(emb_src, src_lengths,
                                               params["encoder_src"])
    dist = None  # ev is None -> bridge not applied
    del dist

    # Batched template ("ref") encoder: fold the N templates into the batch dim,
    # run encoder_ref once, then re-split and concatenate contexts along time
    # (equivalent to encoding each template and cat(dim=0)).
    n_tpl = len(template_inputs)
    B = src_inputs.shape[1]
    T_ref = template_inputs[0].shape[0]
    tpl_all = jnp.concatenate(template_inputs, axis=1)              # [Tref, N*B]
    len_all = jnp.concatenate(template_lengths, axis=0)             # [N*B]
    emb_ref_all = params["dec_embedding"][tpl_all]                  # [Tref,N*B,E]
    ctx_all, _ = run_gru_encoder(emb_ref_all, len_all, params["encoder_ref"])
    ref_contexts = jnp.concatenate(
        [ctx_all[:, n * B:(n + 1) * B, :] for n in range(n_tpl)], axis=0)
    ref_mask = jnp.concatenate(
        [sequence_mask(template_lengths[n], T_ref) for n in range(n_tpl)],
        axis=1)                                                     # [B, N*Tref]
    src_mask = sequence_mask(src_lengths, src_inputs.shape[0])      # [B, Tsrc]

    # ---- init decoder state ----
    dec_init_hidden = enc_hidden

    # ---- decode ----
    emb_tgt = params["dec_embedding"][tgt_inputs]                   # [Ttgt,B,E]
    dec_outputs, attn = decode(emb_tgt, ref_contexts, ref_mask,
                               src_contexts, src_mask, dec_init_hidden,
                               params["decoder_gru"],
                               params["wc"], params["bc"])
    return dec_outputs, attn


# -----------------------------------------------------------------------------
# Deterministic parameter init
# -----------------------------------------------------------------------------
def make_gru_params(key, in_dim, hidden):
    kx, kh = jax.random.split(key)
    s = 0.1
    return {
        "wx": (s * jax.random.normal(kx, (in_dim, 3 * hidden),
                                     jnp.float32)).astype(WDTYPE),
        "wh": (s * jax.random.normal(kh, (hidden, 3 * hidden),
                                     jnp.float32)).astype(WDTYPE),
        "bx": jnp.zeros((1, 3 * hidden), jnp.float32),
        "bh": jnp.zeros((1, 3 * hidden), jnp.float32),
    }


def init_params(key, vocab, emb_dim, hidden):
    ks = jax.random.split(key, 7)
    return {
        "enc_embedding": 0.1 * jax.random.normal(ks[0], (vocab, emb_dim), jnp.float32),
        "dec_embedding": 0.1 * jax.random.normal(ks[1], (vocab, emb_dim), jnp.float32),
        "encoder_src": make_gru_params(ks[2], emb_dim, hidden),
        "encoder_ref": make_gru_params(ks[3], emb_dim, hidden),
        "decoder_gru": make_gru_params(ks[4], emb_dim, hidden),
        "wc": (0.1 * jax.random.normal(ks[5], (3 * hidden, hidden),
                                       jnp.float32)).astype(WDTYPE),
        "bc": jnp.zeros((1, hidden), jnp.float32),
    }


# -----------------------------------------------------------------------------
if __name__ == "__main__":
    # Lane/sublane friendly small shapes: B=8 (sublane), H=128 (lane).
    VOCAB, EMB, HID = 64, 32, 128
    B, T_SRC, T_TGT, T_REF = 8, 8, 6, 5
    N_TEMPLATES = 2

    key = jax.random.PRNGKey(0)
    k_par, k_src, k_tgt, k_tpl = jax.random.split(key, 4)
    params = init_params(k_par, VOCAB, EMB, HID)

    src_inputs = jax.random.randint(k_src, (T_SRC, B), 0, VOCAB, jnp.int32)
    tgt_inputs = jax.random.randint(k_tgt, (T_TGT, B), 0, VOCAB, jnp.int32)
    tpl_keys = jax.random.split(k_tpl, N_TEMPLATES)
    template_inputs = [
        jax.random.randint(tk, (T_REF, B), 0, VOCAB, jnp.int32) for tk in tpl_keys
    ]
    src_lengths = jnp.array([8, 6, 8, 7, 5, 8, 6, 8], jnp.int32)
    template_lengths = [jnp.array([5, 4, 5, 3, 5, 4, 5, 2], jnp.int32),
                        jnp.array([3, 5, 4, 5, 2, 5, 3, 5], jnp.int32)]

    fwd = jax.jit(response_generator_forward)
    dec_outputs, attn = fwd(params, src_inputs, tgt_inputs, template_inputs,
                            src_lengths, template_lengths)

    jax.block_until_ready(dec_outputs)
    jax.block_until_ready(attn)
    assert dec_outputs.shape == (T_TGT, B, HID)
    assert attn.shape == (T_TGT, B, N_TEMPLATES * T_REF)
    assert bool(jnp.all(jnp.isfinite(dec_outputs)))
    assert bool(jnp.all(jnp.isfinite(attn)))
    print("KERNEL_OK")
</pallas_src>

<mosaic_0001>
module attributes {stable_mosaic.version = 11 : i64} {
  func.func @_encoder_kernel(%arg0: i32, %arg1: memref<1x8x32xf32, #tpu.memory_space<vmem>>, %arg2: memref<32x384xbf16, #tpu.memory_space<vmem>>, %arg3: memref<128x384xbf16, #tpu.memory_space<vmem>>, %arg4: memref<1x384xf32, #tpu.memory_space<vmem>>, %arg5: memref<1x384xf32, #tpu.memory_space<vmem>>, %arg6: memref<1x8x128xf32, #tpu.memory_space<vmem>>, %arg7: memref<8x128xf32, #tpu.memory_space<vmem>>) attributes {dimension_semantics = [#tpu.dimension_semantics<arbitrary>], iteration_bounds = array<i64: 8>, scalar_prefetch = 0 : i64, scratch_operands = 1 : i64, tpu.core_type = #tpu.core_type<tc>, window_params = [{transform_indices = @transform_0, window_bounds = array<i64: 1, 8, 32>}, {pipeline_mode = #tpu.pipeline_mode<synchronous>, transform_indices = @transform_1, window_bounds = array<i64: 32, 384>}, {pipeline_mode = #tpu.pipeline_mode<synchronous>, transform_indices = @transform_2, window_bounds = array<i64: 128, 384>}, {pipeline_mode = #tpu.pipeline_mode<synchronous>, transform_indices = @transform_3, window_bounds = array<i64: 1, 384>}, {pipeline_mode = #tpu.pipeline_mode<synchronous>, transform_indices = @transform_4, window_bounds = array<i64: 1, 384>}, {transform_indices = @transform_5, window_bounds = array<i64: 1, 8, 128>}]} {
    %c0_i32 = arith.constant 0 : i32
    %0 = arith.cmpi eq, %arg0, %c0_i32 : i32
    %1 = arith.extui %0 : i1 to i32
    %c0_i32_0 = arith.constant 0 : i32
    %2 = arith.cmpi ne, %1, %c0_i32_0 : i32
    scf.if %2 {
      %cst_22 = arith.constant 0.000000e+00 : f32
      %48 = vector.broadcast %cst_22 : f32 to vector<8x128xf32>
      %c0_23 = arith.constant 0 : index
      %c0_24 = arith.constant 0 : index
      %49 = vector.load %arg7[%c0_23, %c0_24] : memref<8x128xf32, #tpu.memory_space<vmem>>, vector<8x128xf32>
      tpu.vector_store %arg7[%c0_23, %c0_24], %48 {strides = array<i32>} : memref<8x128xf32, #tpu.memory_space<vmem>>, vector<8x128xf32>,
    } else {
    }
    %c0 = arith.constant 0 : index
    %c0_1 = arith.constant 0 : index
    %c0_2 = arith.constant 0 : index
    %3 = vector.load %arg1[%c0, %c0_1, %c0_2] : memref<1x8x32xf32, #tpu.memory_space<vmem>>, vector<1x8x32xf32>
    %4 = vector.shape_cast %3 : vector<1x8x32xf32> to vector<8x32xf32>
    %c0_3 = arith.constant 0 : index
    %c0_4 = arith.constant 0 : index
    %5 = vector.load %arg7[%c0_3, %c0_4] : memref<8x128xf32, #tpu.memory_space<vmem>>, vector<8x128xf32>
    %6 = arith.truncf %4 : vector<8x32xf32> to vector<8x32xbf16>
    %c0_5 = arith.constant 0 : index
    %c0_6 = arith.constant 0 : index
    %7 = vector.load %arg2[%c0_5, %c0_6] : memref<32x384xbf16, #tpu.memory_space<vmem>>, vector<32x384xbf16>
    %cst = arith.constant dense<0.000000e+00> : vector<8x384xf32>
    %8 = tpu.matmul %6, %7, %cst {dimension_numbers = #tpu.dot_dimension_numbers<[1], [0], [0], [1], [0, 0, 1, 1], [], []>} : vector<8x32xbf16>, vector<32x384xbf16>, vector<8x384xf32> -> vector<8x384xf32>
    %c0_7 = arith.constant 0 : index
    %c0_8 = arith.constant 0 : index
    %9 = vector.load %arg4[%c0_7, %c0_8] : memref<1x384xf32, #tpu.memory_space<vmem>>, vector<1x384xf32>
    %10 = vector.broadcast %9 : vector<1x384xf32> to vector<8x384xf32>
    %11 = arith.addf %8, %10 : vector<8x384xf32>
    %12 = arith.truncf %5 : vector<8x128xf32> to vector<8x128xbf16>
    %c0_9 = arith.constant 0 : index
    %c0_10 = arith.constant 0 : index
    %13 = vector.load %arg3[%c0_9, %c0_10] : memref<128x384xbf16, #tpu.memory_space<vmem>>, vector<128x384xbf16>
    %cst_11 = arith.constant dense<0.000000e+00> : vector<8x384xf32>
    %14 = tpu.matmul %12, %13, %cst_11 {dimension_numbers = #tpu.dot_dimension_numbers<[1], [0], [0], [1], [0, 0, 1, 1], [], []>} : vector<8x128xbf16>, vector<128x384xbf16>, vector<8x384xf32> -> vector<8x384xf32>
    %c0_12 = arith.constant 0 : index
    %c0_13 = arith.constant 0 : index
    %15 = vector.load %arg5[%c0_12, %c0_13] : memref<1x384xf32, #tpu.memory_space<vmem>>, vector<1x384xf32>
    %16 = vector.broadcast %15 : vector<1x384xf32> to vector<8x384xf32>
    %17 = arith.addf %14, %16 : vector<8x384xf32>
    %18 = vector.extract_strided_slice %11 {offsets = [0, 0], sizes = [8, 128], strides = [1, 1]} : vector<8x384xf32> to vector<8x128xf32>
    %19 = vector.extract_strided_slice %17 {offsets = [0, 0], sizes = [8, 128], strides = [1, 1]} : vector<8x384xf32> to vector<8x128xf32>
    %20 = arith.addf %18, %19 : vector<8x128xf32>
    %21 = arith.negf %20 : vector<8x128xf32>
    %22 = math.exp %21 : vector<8x128xf32>
    %cst_14 = arith.constant 1.000000e+00 : f32
    %23 = vector.broadcast %cst_14 : f32 to vector<8x128xf32>
    %24 = arith.addf %23, %22 : vector<8x128xf32>
    %25 = arith.divf %23, %24 : vector<8x128xf32>
    %26 = vector.extract_strided_slice %11 {offsets = [0, 128], sizes = [8, 128], strides = [1, 1]} : vector<8x384xf32> to vector<8x128xf32>
    %27 = vector.extract_strided_slice %17 {offsets = [0, 128], sizes = [8, 128], strides = [1, 1]} : vector<8x384xf32> to vector<8x128xf32>
    %28 = arith.addf %26, %27 : vector<8x128xf32>
    %29 = arith.negf %28 : vector<8x128xf32>
    %30 = math.exp %29 : vector<8x128xf32>
    %cst_15 = arith.constant 1.000000e+00 : f32
    %31 = vector.broadcast %cst_15 : f32 to vector<8x128xf32>
    %32 = arith.addf %31, %30 : vector<8x128xf32>
    %33 = arith.divf %31, %32 : vector<8x128xf32>
    %34 = vector.extract_strided_slice %11 {offsets = [0, 256], sizes = [8, 128], strides = [1, 1]} : vector<8x384xf32> to vector<8x128xf32>
    %35 = vector.extract_strided_slice %17 {offsets = [0, 256], sizes = [8, 128], strides = [1, 1]} : vector<8x384xf32> to vector<8x128xf32>
    %36 = arith.mulf %25, %35 : vector<8x128xf32>
    %37 = arith.addf %34, %36 : vector<8x128xf32>
    %38 = math.tanh %37 : vector<8x128xf32>
    %cst_16 = arith.constant 1.000000e+00 : f32
    %39 = vector.broadcast %cst_16 : f32 to vector<8x128xf32>
    %40 = arith.subf %39, %33 : vector<8x128xf32>
    %41 = arith.mulf %40, %38 : vector<8x128xf32>
    %42 = arith.mulf %33, %5 : vector<8x128xf32>
    %43 = arith.addf %41, %42 : vector<8x128xf32>
    %c0_17 = arith.constant 0 : index
    %c0_18 = arith.constant 0 : index
    %44 = vector.load %arg7[%c0_17, %c0_18] : memref<8x128xf32, #tpu.memory_space<vmem>>, vector<8x128xf32>
    tpu.vector_store %arg7[%c0_17, %c0_18], %43 {strides = array<i32>} : memref<8x128xf32, #tpu.memory_space<vmem>>, vector<8x128xf32>,
    %c0_19 = arith.constant 0 : index
    %c0_20 = arith.constant 0 : index
    %c0_21 = arith.constant 0 : index
    %45 = vector.load %arg6[%c0_19, %c0_20, %c0_21] : memref<1x8x128xf32, #tpu.memory_space<vmem>>, vector<1x8x128xf32>
    %46 = vector.shape_cast %45 : vector<1x8x128xf32> to vector<8x128xf32>
    %47 = vector.shape_cast %43 : vector<8x128xf32> to vector<1x8x128xf32>
    tpu.vector_store %arg6[%c0_19, %c0_20, %c0_21], %47 {strides = array<i32>} : memref<1x8x128xf32, #tpu.memory_space<vmem>>, vector<1x8x128xf32>,
    return
  }
  func.func @transform_0(%arg0: i32) -> (i32, i32, i32) {
    %c0_i32 = arith.constant 0 : i32
    %c0_i32_0 = arith.constant 0 : i32
    %c0_i32_1 = arith.constant 0 : i32
    return %arg0, %c0_i32, %c0_i32_0 : i32, i32, i32
  }
  func.func @transform_1(%arg0: i32) -> (i32, i32) {
    %c0_i32 = arith.constant 0 : i32
    %c0_i32_0 = arith.constant 0 : i32
    %c0_i32_1 = arith.constant 0 : i32
    return %c0_i32, %c0_i32_0 : i32, i32
  }
  func.func @transform_2(%arg0: i32) -> (i32, i32) {
    %c0_i32 = arith.constant 0 : i32
    %c0_i32_0 = arith.constant 0 : i32
    %c0_i32_1 = arith.constant 0 : i32
    return %c0_i32, %c0_i32_0 : i32, i32
  }
  func.func @transform_3(%arg0: i32) -> (i32, i32) {
    %c0_i32 = arith.constant 0 : i32
    %c0_i32_0 = arith.constant 0 : i32
    %c0_i32_1 = arith.constant 0 : i32
    return %c0_i32, %c0_i32_0 : i32, i32
  }
  func.func @transform_4(%arg0: i32) -> (i32, i32) {
    %c0_i32 = arith.constant 0 : i32
    %c0_i32_0 = arith.constant 0 : i32
    %c0_i32_1 = arith.constant 0 : i32
    return %c0_i32, %c0_i32_0 : i32, i32
  }
  func.func @transform_5(%arg0: i32) -> (i32, i32, i32) {
    %c0_i32 = arith.constant 0 : i32
    %c0_i32_0 = arith.constant 0 : i32
    %c0_i32_1 = arith.constant 0 : i32
    return %arg0, %c0_i32, %c0_i32_0 : i32, i32, i32
  }
}

module attributes {stable_mosaic.version = 11 : i64} {
  func.func @_encoder_kernel(%arg0: i32, %arg1: memref<1x16x32xf32, #tpu.memory_space<vmem>>, %arg2: memref<32x384xbf16, #tpu.memory_space<vmem>>, %arg3: memref<128x384xbf16, #tpu.memory_space<vmem>>, %arg4: memref<1x384xf32, #tpu.memory_space<vmem>>, %arg5: memref<1x384xf32, #tpu.memory_space<vmem>>, %arg6: memref<1x16x128xf32, #tpu.memory_space<vmem>>, %arg7: memref<16x128xf32, #tpu.memory_space<vmem>>) attributes {dimension_semantics = [#tpu.dimension_semantics<arbitrary>], iteration_bounds = array<i64: 5>, scalar_prefetch = 0 : i64, scratch_operands = 1 : i64, tpu.core_type = #tpu.core_type<tc>, window_params = [{transform_indices = @transform_0, window_bounds = array<i64: 1, 16, 32>}, {pipeline_mode = #tpu.pipeline_mode<synchronous>, transform_indices = @transform_1, window_bounds = array<i64: 32, 384>}, {pipeline_mode = #tpu.pipeline_mode<synchronous>, transform_indices = @transform_2, window_bounds = array<i64: 128, 384>}, {pipeline_mode = #tpu.pipeline_mode<synchronous>, transform_indices = @transform_3, window_bounds = array<i64: 1, 384>}, {pipeline_mode = #tpu.pipeline_mode<synchronous>, transform_indices = @transform_4, window_bounds = array<i64: 1, 384>}, {transform_indices = @transform_5, window_bounds = array<i64: 1, 16, 128>}]} {
    %c0_i32 = arith.constant 0 : i32
    %0 = arith.cmpi eq, %arg0, %c0_i32 : i32
    %1 = arith.extui %0 : i1 to i32
    %c0_i32_0 = arith.constant 0 : i32
    %2 = arith.cmpi ne, %1, %c0_i32_0 : i32
    scf.if %2 {
      %cst_22 = arith.constant 0.000000e+00 : f32
      %48 = vector.broadcast %cst_22 : f32 to vector<16x128xf32>
      %c0_23 = arith.constant 0 : index
      %c0_24 = arith.constant 0 : index
      %49 = vector.load %arg7[%c0_23, %c0_24] : memref<16x128xf32, #tpu.memory_space<vmem>>, vector<16x128xf32>
      tpu.vector_store %arg7[%c0_23, %c0_24], %48 {strides = array<i32>} : memref<16x128xf32, #tpu.memory_space<vmem>>, vector<16x128xf32>,
    } else {
    }
    %c0 = arith.constant 0 : index
    %c0_1 = arith.constant 0 : index
    %c0_2 = arith.constant 0 : index
    %3 = vector.load %arg1[%c0, %c0_1, %c0_2] : memref<1x16x32xf32, #tpu.memory_space<vmem>>, vector<1x16x32xf32>
    %4 = vector.shape_cast %3 : vector<1x16x32xf32> to vector<16x32xf32>
    %c0_3 = arith.constant 0 : index
    %c0_4 = arith.constant 0 : index
    %5 = vector.load %arg7[%c0_3, %c0_4] : memref<16x128xf32, #tpu.memory_space<vmem>>, vector<16x128xf32>
    %6 = arith.truncf %4 : vector<16x32xf32> to vector<16x32xbf16>
    %c0_5 = arith.constant 0 : index
    %c0_6 = arith.constant 0 : index
    %7 = vector.load %arg2[%c0_5, %c0_6] : memref<32x384xbf16, #tpu.memory_space<vmem>>, vector<32x384xbf16>
    %cst = arith.constant dense<0.000000e+00> : vector<16x384xf32>
    %8 = tpu.matmul %6, %7, %cst {dimension_numbers = #tpu.dot_dimension_numbers<[1], [0], [0], [1], [0, 0, 1, 1], [], []>} : vector<16x32xbf16>, vector<32x384xbf16>, vector<16x384xf32> -> vector<16x384xf32>
    %c0_7 = arith.constant 0 : index
    %c0_8 = arith.constant 0 : index
    %9 = vector.load %arg4[%c0_7, %c0_8] : memref<1x384xf32, #tpu.memory_space<vmem>>, vector<1x384xf32>
    %10 = vector.broadcast %9 : vector<1x384xf32> to vector<16x384xf32>
    %11 = arith.addf %8, %10 : vector<16x384xf32>
    %12 = arith.truncf %5 : vector<16x128xf32> to vector<16x128xbf16>
    %c0_9 = arith.constant 0 : index
    %c0_10 = arith.constant 0 : index
    %13 = vector.load %arg3[%c0_9, %c0_10] : memref<128x384xbf16, #tpu.memory_space<vmem>>, vector<128x384xbf16>
    %cst_11 = arith.constant dense<0.000000e+00> : vector<16x384xf32>
    %14 = tpu.matmul %12, %13, %cst_11 {dimension_numbers = #tpu.dot_dimension_numbers<[1], [0], [0], [1], [0, 0, 1, 1], [], []>} : vector<16x128xbf16>, vector<128x384xbf16>, vector<16x384xf32> -> vector<16x384xf32>
    %c0_12 = arith.constant 0 : index
    %c0_13 = arith.constant 0 : index
    %15 = vector.load %arg5[%c0_12, %c0_13] : memref<1x384xf32, #tpu.memory_space<vmem>>, vector<1x384xf32>
    %16 = vector.broadcast %15 : vector<1x384xf32> to vector<16x384xf32>
    %17 = arith.addf %14, %16 : vector<16x384xf32>
    %18 = vector.extract_strided_slice %11 {offsets = [0, 0], sizes = [16, 128], strides = [1, 1]} : vector<16x384xf32> to vector<16x128xf32>
    %19 = vector.extract_strided_slice %17 {offsets = [0, 0], sizes = [16, 128], strides = [1, 1]} : vector<16x384xf32> to vector<16x128xf32>
    %20 = arith.addf %18, %19 : vector<16x128xf32>
    %21 = arith.negf %20 : vector<16x128xf32>
    %22 = math.exp %21 : vector<16x128xf32>
    %cst_14 = arith.constant 1.000000e+00 : f32
    %23 = vector.broadcast %cst_14 : f32 to vector<16x128xf32>
    %24 = arith.addf %23, %22 : vector<16x128xf32>
    %25 = arith.divf %23, %24 : vector<16x128xf32>
    %26 = vector.extract_strided_slice %11 {offsets = [0, 128], sizes = [16, 128], strides = [1, 1]} : vector<16x384xf32> to vector<16x128xf32>
    %27 = vector.extract_strided_slice %17 {offsets = [0, 128], sizes = [16, 128], strides = [1, 1]} : vector<16x384xf32> to vector<16x128xf32>
    %28 = arith.addf %26, %27 : vector<16x128xf32>
    %29 = arith.negf %28 : vector<16x128xf32>
    %30 = math.exp %29 : vector<16x128xf32>
    %cst_15 = arith.constant 1.000000e+00 : f32
    %31 = vector.broadcast %cst_15 : f32 to vector<16x128xf32>
    %32 = arith.addf %31, %30 : vector<16x128xf32>
    %33 = arith.divf %31, %32 : vector<16x128xf32>
    %34 = vector.extract_strided_slice %11 {offsets = [0, 256], sizes = [16, 128], strides = [1, 1]} : vector<16x384xf32> to vector<16x128xf32>
    %35 = vector.extract_strided_slice %17 {offsets = [0, 256], sizes = [16, 128], strides = [1, 1]} : vector<16x384xf32> to vector<16x128xf32>
    %36 = arith.mulf %25, %35 : vector<16x128xf32>
    %37 = arith.addf %34, %36 : vector<16x128xf32>
    %38 = math.tanh %37 : vector<16x128xf32>
    %cst_16 = arith.constant 1.000000e+00 : f32
    %39 = vector.broadcast %cst_16 : f32 to vector<16x128xf32>
    %40 = arith.subf %39, %33 : vector<16x128xf32>
    %41 = arith.mulf %40, %38 : vector<16x128xf32>
    %42 = arith.mulf %33, %5 : vector<16x128xf32>
    %43 = arith.addf %41, %42 : vector<16x128xf32>
    %c0_17 = arith.constant 0 : index
    %c0_18 = arith.constant 0 : index
    %44 = vector.load %arg7[%c0_17, %c0_18] : memref<16x128xf32, #tpu.memory_space<vmem>>, vector<16x128xf32>
    tpu.vector_store %arg7[%c0_17, %c0_18], %43 {strides = array<i32>} : memref<16x128xf32, #tpu.memory_space<vmem>>, vector<16x128xf32>,
    %c0_19 = arith.constant 0 : index
    %c0_20 = arith.constant 0 : index
    %c0_21 = arith.constant 0 : index
    %45 = vector.load %arg6[%c0_19, %c0_20, %c0_21] : memref<1x16x128xf32, #tpu.memory_space<vmem>>, vector<1x16x128xf32>
    %46 = vector.shape_cast %45 : vector<1x16x128xf32> to vector<16x128xf32>
    %47 = vector.shape_cast %43 : vector<16x128xf32> to vector<1x16x128xf32>
    tpu.vector_store %arg6[%c0_19, %c0_20, %c0_21], %47 {strides = array<i32>} : memref<1x16x128xf32, #tpu.memory_space<vmem>>, vector<1x16x128xf32>,
    return
  }
  func.func @transform_0(%arg0: i32) -> (i32, i32, i32) {
    %c0_i32 = arith.constant 0 : i32
    %c0_i32_0 = arith.constant 0 : i32
    %c0_i32_1 = arith.constant 0 : i32
    return %arg0, %c0_i32, %c0_i32_0 : i32, i32, i32
  }
  func.func @transform_1(%arg0: i32) -> (i32, i32) {
    %c0_i32 = arith.constant 0 : i32
    %c0_i32_0 = arith.constant 0 : i32
    %c0_i32_1 = arith.constant 0 : i32
    return %c0_i32, %c0_i32_0 : i32, i32
  }
  func.func @transform_2(%arg0: i32) -> (i32, i32) {
    %c0_i32 = arith.constant 0 : i32
    %c0_i32_0 = arith.constant 0 : i32
    %c0_i32_1 = arith.constant 0 : i32
    return %c0_i32, %c0_i32_0 : i32, i32
  }
  func.func @transform_3(%arg0: i32) -> (i32, i32) {
    %c0_i32 = arith.constant 0 : i32
    %c0_i32_0 = arith.constant 0 : i32
    %c0_i32_1 = arith.constant 0 : i32
    return %c0_i32, %c0_i32_0 : i32, i32
  }
  func.func @transform_4(%arg0: i32) -> (i32, i32) {
    %c0_i32 = arith.constant 0 : i32
    %c0_i32_0 = arith.constant 0 : i32
    %c0_i32_1 = arith.constant 0 : i32
    return %c0_i32, %c0_i32_0 : i32, i32
  }
  func.func @transform_5(%arg0: i32) -> (i32, i32, i32) {
    %c0_i32 = arith.constant 0 : i32
    %c0_i32_0 = arith.constant 0 : i32
    %c0_i32_1 = arith.constant 0 : i32
    return %arg0, %c0_i32, %c0_i32_0 : i32, i32, i32
  }
}

module attributes {stable_mosaic.version = 11 : i64} {
  func.func @_decoder_kernel(%arg0: i32, %arg1: memref<1x8x32xf32, #tpu.memory_space<vmem>>, %arg2: memref<8x128xf32, #tpu.memory_space<vmem>>, %arg3: memref<32x384xbf16, #tpu.memory_space<vmem>>, %arg4: memref<128x384xbf16, #tpu.memory_space<vmem>>, %arg5: memref<1x384xf32, #tpu.memory_space<vmem>>, %arg6: memref<1x384xf32, #tpu.memory_space<vmem>>, %arg7: memref<8x10x128xf32, #tpu.memory_space<vmem>>, %arg8: memref<8x10xf32, #tpu.memory_space<vmem>>, %arg9: memref<8x8x128xf32, #tpu.memory_space<vmem>>, %arg10: memref<8x8xf32, #tpu.memory_space<vmem>>, %arg11: memref<384x128xbf16, #tpu.memory_space<vmem>>, %arg12: memref<1x128xf32, #tpu.memory_space<vmem>>, %arg13: memref<1x8x128xf32, #tpu.memory_space<vmem>>, %arg14: memref<1x8x10xf32, #tpu.memory_space<vmem>>, %arg15: memref<8x128xf32, #tpu.memory_space<vmem>>) attributes {dimension_semantics = [#tpu.dimension_semantics<arbitrary>], iteration_bounds = array<i64: 6>, scalar_prefetch = 0 : i64, scratch_operands = 1 : i64, tpu.core_type = #tpu.core_type<tc>, window_params = [{transform_indices = @transform_0, window_bounds = array<i64: 1, 8, 32>}, {pipeline_mode = #tpu.pipeline_mode<synchronous>, transform_indices = @transform_1, window_bounds = array<i64: 8, 128>}, {pipeline_mode = #tpu.pipeline_mode<synchronous>, transform_indices = @transform_2, window_bounds = array<i64: 32, 384>}, {pipeline_mode = #tpu.pipeline_mode<synchronous>, transform_indices = @transform_3, window_bounds = array<i64: 128, 384>}, {pipeline_mode = #tpu.pipeline_mode<synchronous>, transform_indices = @transform_4, window_bounds = array<i64: 1, 384>}, {pipeline_mode = #tpu.pipeline_mode<synchronous>, transform_indices = @transform_5, window_bounds = array<i64: 1, 384>}, {pipeline_mode = #tpu.pipeline_mode<synchronous>, transform_indices = @transform_6, window_bounds = array<i64: 8, 10, 128>}, {pipeline_mode = #tpu.pipeline_mode<synchronous>, transform_indices = @transform_7, window_bounds = array<i64: 8, 10>}, {pipeline_mode = #tpu.pipeline_mode<synchronous>, transform_indices = @transform_8, window_bounds = array<i64: 8, 8, 128>}, {pipeline_mode = #tpu.pipeline_mode<synchronous>, transform_indices = @transform_9, window_bounds = array<i64: 8, 8>}, {pipeline_mode = #tpu.pipeline_mode<synchronous>, transform_indices = @transform_10, window_bounds = array<i64: 384, 128>}, {pipeline_mode = #tpu.pipeline_mode<synchronous>, transform_indices = @transform_11, window_bounds = array<i64: 1, 128>}, {transform_indices = @transform_12, window_bounds = array<i64: 1, 8, 128>}, {transform_indices = @transform_13, window_bounds = array<i64: 1, 8, 10>}]} {
    %c0_i32 = arith.constant 0 : i32
    %0 = arith.cmpi eq, %arg0, %c0_i32 : i32
    %1 = arith.extui %0 : i1 to i32
    %c0_i32_0 = arith.constant 0 : i32
    %2 = arith.cmpi ne, %1, %c0_i32_0 : i32
    scf.if %2 {
      %c0_56 = arith.constant 0 : index
      %c0_57 = arith.constant 0 : index
      %114 = vector.load %arg2[%c0_56, %c0_57] : memref<8x128xf32, #tpu.memory_space<vmem>>, vector<8x128xf32>
      %c0_58 = arith.constant 0 : index
      %c0_59 = arith.constant 0 : index
      %115 = vector.load %arg15[%c0_58, %c0_59] : memref<8x128xf32, #tpu.memory_space<vmem>>, vector<8x128xf32>
      tpu.vector_store %arg15[%c0_58, %c0_59], %114 {strides = array<i32>} : memref<8x128xf32, #tpu.memory_space<vmem>>, vector<8x128xf32>,
    } else {
    }
    %c0 = arith.constant 0 : index
    %c0_1 = arith.constant 0 : index
    %c0_2 = arith.constant 0 : index
    %3 = vector.load %arg1[%c0, %c0_1, %c0_2] : memref<1x8x32xf32, #tpu.memory_space<vmem>>, vector<1x8x32xf32>
    %4 = vector.shape_cast %3 : vector<1x8x32xf32> to vector<8x32xf32>
    %c0_3 = arith.constant 0 : index
    %c0_4 = arith.constant 0 : index
    %5 = vector.load %arg15[%c0_3, %c0_4] : memref<8x128xf32, #tpu.memory_space<vmem>>, vector<8x128xf32>
    %6 = arith.truncf %4 : vector<8x32xf32> to vector<8x32xbf16>
    %c0_5 = arith.constant 0 : index
    %c0_6 = arith.constant 0 : index
    %7 = vector.load %arg3[%c0_5, %c0_6] : memref<32x384xbf16, #tpu.memory_space<vmem>>, vector<32x384xbf16>
    %cst = arith.constant dense<0.000000e+00> : vector<8x384xf32>
    %8 = tpu.matmul %6, %7, %cst {dimension_numbers = #tpu.dot_dimension_numbers<[1], [0], [0], [1], [0, 0, 1, 1], [], []>} : vector<8x32xbf16>, vector<32x384xbf16>, vector<8x384xf32> -> vector<8x384xf32>
    %c0_7 = arith.constant 0 : index
    %c0_8 = arith.constant 0 : index
    %9 = vector.load %arg5[%c0_7, %c0_8] : memref<1x384xf32, #tpu.memory_space<vmem>>, vector<1x384xf32>
    %10 = vector.broadcast %9 : vector<1x384xf32> to vector<8x384xf32>
    %11 = arith.addf %8, %10 : vector<8x384xf32>
    %12 = arith.truncf %5 : vector<8x128xf32> to vector<8x128xbf16>
    %c0_9 = arith.constant 0 : index
    %c0_10 = arith.constant 0 : index
    %13 = vector.load %arg4[%c0_9, %c0_10] : memref<128x384xbf16, #tpu.memory_space<vmem>>, vector<128x384xbf16>
    %cst_11 = arith.constant dense<0.000000e+00> : vector<8x384xf32>
    %14 = tpu.matmul %12, %13, %cst_11 {dimension_numbers = #tpu.dot_dimension_numbers<[1], [0], [0], [1], [0, 0, 1, 1], [], []>} : vector<8x128xbf16>, vector<128x384xbf16>, vector<8x384xf32> -> vector<8x384xf32>
    %c0_12 = arith.constant 0 : index
    %c0_13 = arith.constant 0 : index
    %15 = vector.load %arg6[%c0_12, %c0_13] : memref<1x384xf32, #tpu.memory_space<vmem>>, vector<1x384xf32>
    %16 = vector.broadcast %15 : vector<1x384xf32> to vector<8x384xf32>
    %17 = arith.addf %14, %16 : vector<8x384xf32>
    %18 = vector.extract_strided_slice %11 {offsets = [0, 0], sizes = [8, 128], strides = [1, 1]} : vector<8x384xf32> to vector<8x128xf32>
    %19 = vector.extract_strided_slice %17 {offsets = [0, 0], sizes = [8, 128], strides = [1, 1]} : vector<8x384xf32> to vector<8x128xf32>
    %20 = arith.addf %18, %19 : vector<8x128xf32>
    %21 = arith.negf %20 : vector<8x128xf32>
    %22 = math.exp %21 : vector<8x128xf32>
    %cst_14 = arith.constant 1.000000e+00 : f32
    %23 = vector.broadcast %cst_14 : f32 to vector<8x128xf32>
    %24 = arith.addf %23, %22 : vector<8x128xf32>
    %25 = arith.divf %23, %24 : vector<8x128xf32>
    %26 = vector.extract_strided_slice %11 {offsets = [0, 128], sizes = [8, 128], strides = [1, 1]} : vector<8x384xf32> to vector<8x128xf32>
    %27 = vector.extract_strided_slice %17 {offsets = [0, 128], sizes = [8, 128], strides = [1, 1]} : vector<8x384xf32> to vector<8x128xf32>
    %28 = arith.addf %26, %27 : vector<8x128xf32>
    %29 = arith.negf %28 : vector<8x128xf32>
    %30 = math.exp %29 : vector<8x128xf32>
    %cst_15 = arith.constant 1.000000e+00 : f32
    %31 = vector.broadcast %cst_15 : f32 to vector<8x128xf32>
    %32 = arith.addf %31, %30 : vector<8x128xf32>
    %33 = arith.divf %31, %32 : vector<8x128xf32>
    %34 = vector.extract_strided_slice %11 {offsets = [0, 256], sizes = [8, 128], strides = [1, 1]} : vector<8x384xf32> to vector<8x128xf32>
    %35 = vector.extract_strided_slice %17 {offsets = [0, 256], sizes = [8, 128], strides = [1, 1]} : vector<8x384xf32> to vector<8x128xf32>
    %36 = arith.mulf %25, %35 : vector<8x128xf32>
    %37 = arith.addf %34, %36 : vector<8x128xf32>
    %38 = math.tanh %37 : vector<8x128xf32>
    %cst_16 = arith.constant 1.000000e+00 : f32
    %39 = vector.broadcast %cst_16 : f32 to vector<8x128xf32>
    %40 = arith.subf %39, %33 : vector<8x128xf32>
    %41 = arith.mulf %40, %38 : vector<8x128xf32>
    %42 = arith.mulf %33, %5 : vector<8x128xf32>
    %43 = arith.addf %41, %42 : vector<8x128xf32>
    %c0_17 = arith.constant 0 : index
    %c0_18 = arith.constant 0 : index
    %44 = vector.load %arg15[%c0_17, %c0_18] : memref<8x128xf32, #tpu.memory_space<vmem>>, vector<8x128xf32>
    tpu.vector_store %arg15[%c0_17, %c0_18], %43 {strides = array<i32>} : memref<8x128xf32, #tpu.memory_space<vmem>>, vector<8x128xf32>,
    %c0_19 = arith.constant 0 : index
    %c0_20 = arith.constant 0 : index
    %c0_21 = arith.constant 0 : index
    %45 = vector.load %arg7[%c0_19, %c0_20, %c0_21] : memref<8x10x128xf32, #tpu.memory_space<vmem>>, vector<8x10x128xf32>
    %c0_22 = arith.constant 0 : index
    %c0_23 = arith.constant 0 : index
    %46 = vector.load %arg8[%c0_22, %c0_23] : memref<8x10xf32, #tpu.memory_space<vmem>>, vector<8x10xf32>
    %47 = vector.shape_cast %43 : vector<8x128xf32> to vector<8x1x128xf32>
    %48 = vector.broadcast %47 : vector<8x1x128xf32> to vector<8x10x128xf32>
    %49 = arith.mulf %48, %45 : vector<8x10x128xf32>
    %cst_24 = arith.constant dense<0.000000e+00> : vector<8x10xf32>
    %50 = vector.multi_reduction <add>, %49, %cst_24 [2] : vector<8x10x128xf32> to vector<8x10xf32>
    %cst_25 = arith.constant 5.000000e-01 : f32
    %51 = vector.broadcast %cst_25 : f32 to vector<8x10xf32>
    %52 = arith.cmpf ogt, %46, %51 : vector<8x10xf32>
    %cst_26 = arith.constant -1.000000e+09 : f32
    %53 = vector.broadcast %cst_26 : f32 to vector<8x10xf32>
    %54 = arith.select %52, %50, %53 : vector<8x10xi1>, vector<8x10xf32>
    %cst_27 = arith.constant dense<0xFF800000> : vector<8xf32>
    %55 = vector.multi_reduction <maximumf>, %54, %cst_27 [1] : vector<8x10xf32> to vector<8xf32>
    %56 = vector.shape_cast %55 : vector<8xf32> to vector<8x1xf32>
    %57 = vector.broadcast %56 : vector<8x1xf32> to vector<8x10xf32>
    %58 = arith.subf %54, %57 : vector<8x10xf32>
    %59 = math.exp %58 : vector<8x10xf32>
    %cst_28 = arith.constant dense<0.000000e+00> : vector<8xf32>
    %60 = vector.multi_reduction <add>, %59, %cst_28 [1] : vector<8x10xf32> to vector<8xf32>
    %61 = vector.shape_cast %60 : vector<8xf32> to vector<8x1xf32>
    %62 = tpu.reciprocal %61 {approx = true} : vector<8x1xf32> -> vector<8x1xf32>
    %63 = vector.broadcast %62 : vector<8x1xf32> to vector<8x10xf32>
    %64 = arith.mulf %59, %63 : vector<8x10xf32>
    %65 = vector.shape_cast %64 : vector<8x10xf32> to vector<8x10x1xf32>
    %66 = vector.broadcast %65 : vector<8x10x1xf32> to vector<8x10x128xf32>
    %67 = arith.mulf %66, %45 : vector<8x10x128xf32>
    %cst_29 = arith.constant dense<0.000000e+00> : vector<8x128xf32>
    %68 = vector.multi_reduction <add>, %67, %cst_29 [1] : vector<8x10x128xf32> to vector<8x128xf32>
    %c0_30 = arith.constant 0 : index
    %c0_31 = arith.constant 0 : index
    %c0_32 = arith.constant 0 : index
    %69 = vector.load %arg9[%c0_30, %c0_31, %c0_32] : memref<8x8x128xf32, #tpu.memory_space<vmem>>, vector<8x8x128xf32>
    %c0_33 = arith.constant 0 : index
    %c0_34 = arith.constant 0 : index
    %70 = vector.load %arg10[%c0_33, %c0_34] : memref<8x8xf32, #tpu.memory_space<vmem>>, vector<8x8xf32>
    %71 = vector.shape_cast %43 : vector<8x128xf32> to vector<8x1x128xf32>
    %72 = vector.broadcast %71 : vector<8x1x128xf32> to vector<8x8x128xf32>
    %73 = arith.mulf %72, %69 : vector<8x8x128xf32>
    %cst_35 = arith.constant dense<0.000000e+00> : vector<8x8xf32>
    %74 = vector.multi_reduction <add>, %73, %cst_35 [2] : vector<8x8x128xf32> to vector<8x8xf32>
    %cst_36 = arith.constant 5.000000e-01 : f32
    %75 = vector.broadcast %cst_36 : f32 to vector<8x8xf32>
    %76 = arith.cmpf ogt, %70, %75 : vector<8x8xf32>
    %cst_37 = arith.constant -1.000000e+09 : f32
    %77 = vector.broadcast %cst_37 : f32 to vector<8x8xf32>
    %78 = arith.select %76, %74, %77 : vector<8x8xi1>, vector<8x8xf32>
    %cst_38 = arith.constant dense<0xFF800000> : vector<8xf32>
    %79 = vector.multi_reduction <maximumf>, %78, %cst_38 [1] : vector<8x8xf32> to vector<8xf32>
    %80 = vector.shape_cast %79 : vector<8xf32> to vector<8x1xf32>
    %81 = vector.broadcast %80 : vector<8x1xf32> to vector<8x8xf32>
    %82 = arith.subf %78, %81 : vector<8x8xf32>
    %83 = math.exp %82 : vector<8x8xf32>
    %cst_39 = arith.constant dense<0.000000e+00> : vector<8xf32>
    %84 = vector.multi_reduction <add>, %83, %cst_39 [1] : vector<8x8xf32> to vector<8xf32>
    %85 = vector.shape_cast %84 : vector<8xf32> to vector<8x1xf32>
    %86 = tpu.reciprocal %85 {approx = true} : vector<8x1xf32> -> vector<8x1xf32>
    %87 = vector.broadcast %86 : vector<8x1xf32> to vector<8x8xf32>
    %88 = arith.mulf %83, %87 : vector<8x8xf32>
    %89 = vector.shape_cast %88 : vector<8x8xf32> to vector<8x8x1xf32>
    %90 = vector.broadcast %89 : vector<8x8x1xf32> to vector<8x8x128xf32>
    %91 = arith.mulf %90, %69 : vector<8x8x128xf32>
    %cst_40 = arith.constant dense<0.000000e+00> : vector<8x128xf32>
    %92 = vector.multi_reduction <add>, %91, %cst_40 [1] : vector<8x8x128xf32> to vector<8x128xf32>
    %93 = arith.truncf %68 : vector<8x128xf32> to vector<8x128xbf16>
    %c0_41 = arith.constant 0 : index
    %c0_42 = arith.constant 0 : index
    %94 = vector.load %arg11[%c0_41, %c0_42] : memref<384x128xbf16, #tpu.memory_space<vmem>>, vector<128x128xbf16>
    %cst_43 = arith.constant dense<0.000000e+00> : vector<8x128xf32>
    %95 = tpu.matmul %93, %94, %cst_43 {dimension_numbers = #tpu.dot_dimension_numbers<[1], [0], [0], [1], [0, 0, 1, 1], [], []>} : vector<8x128xbf16>, vector<128x128xbf16>, vector<8x128xf32> -> vector<8x128xf32>
    %96 = arith.truncf %92 : vector<8x128xf32> to vector<8x128xbf16>
    %c128 = arith.constant 128 : index
    %c0_44 = arith.constant 0 : index
    %97 = vector.load %arg11[%c128, %c0_44] : memref<384x128xbf16, #tpu.memory_space<vmem>>, vector<128x128xbf16>
    %cst_45 = arith.constant dense<0.000000e+00> : vector<8x128xf32>
    %98 = tpu.matmul %96, %97, %cst_45 {dimension_numbers = #tpu.dot_dimension_numbers<[1], [0], [0], [1], [0, 0, 1, 1], [], []>} : vector<8x128xbf16>, vector<128x128xbf16>, vector<8x128xf32> -> vector<8x128xf32>
    %99 = arith.addf %95, %98 : vector<8x128xf32>
    %100 = arith.truncf %43 : vector<8x128xf32> to vector<8x128xbf16>
    %c256 = arith.constant 256 : index
    %c0_46 = arith.constant 0 : index
    %101 = vector.load %arg11[%c256, %c0_46] : memref<384x128xbf16, #tpu.memory_space<vmem>>, vector<128x128xbf16>
    %cst_47 = arith.constant dense<0.000000e+00> : vector<8x128xf32>
    %102 = tpu.matmul %100, %101, %cst_47 {dimension_numbers = #tpu.dot_dimension_numbers<[1], [0], [0], [1], [0, 0, 1, 1], [], []>} : vector<8x128xbf16>, vector<128x128xbf16>, vector<8x128xf32> -> vector<8x128xf32>
    %103 = arith.addf %99, %102 : vector<8x128xf32>
    %c0_48 = arith.constant 0 : index
    %c0_49 = arith.constant 0 : index
    %104 = vector.load %arg12[%c0_48, %c0_49] : memref<1x128xf32, #tpu.memory_space<vmem>>, vector<1x128xf32>
    %105 = vector.broadcast %104 : vector<1x128xf32> to vector<8x128xf32>
    %106 = arith.addf %103, %105 : vector<8x128xf32>
    %107 = math.tanh %106 : vector<8x128xf32>
    %c0_50 = arith.constant 0 : index
    %c0_51 = arith.constant 0 : index
    %c0_52 = arith.constant 0 : index
    %108 = vector.load %arg13[%c0_50, %c0_51, %c0_52] : memref<1x8x128xf32, #tpu.memory_space<vmem>>, vector<1x8x128xf32>
    %109 = vector.shape_cast %108 : vector<1x8x128xf32> to vector<8x128xf32>
    %110 = vector.shape_cast %107 : vector<8x128xf32> to vector<1x8x128xf32>
    tpu.vector_store %arg13[%c0_50, %c0_51, %c0_52], %110 {strides = array<i32>} : memref<1x8x128xf32, #tpu.memory_space<vmem>>, vector<1x8x128xf32>,
    %c0_53 = arith.constant 0 : index
    %c0_54 = arith.constant 0 : index
    %c0_55 = arith.constant 0 : index
    %111 = vector.load %arg14[%c0_53, %c0_54, %c0_55] : memref<1x8x10xf32, #tpu.memory_space<vmem>>, vector<1x8x10xf32>
    %112 = vector.shape_cast %111 : vector<1x8x10xf32> to vector<8x10xf32>
    %113 = vector.shape_cast %64 : vector<8x10xf32> to vector<1x8x10xf32>
    tpu.vector_store %arg14[%c0_53, %c0_54, %c0_55], %113 {strides = array<i32>} : memref<1x8x10xf32, #tpu.memory_space<vmem>>, vector<1x8x10xf32>,
    return
  }
  func.func @transform_0(%arg0: i32) -> (i32, i32, i32) {
    %c0_i32 = arith.constant 0 : i32
    %c0_i32_0 = arith.constant 0 : i32
    %c0_i32_1 = arith.constant 0 : i32
    return %arg0, %c0_i32, %c0_i32_0 : i32, i32, i32
  }
  func.func @transform_1(%arg0: i32) -> (i32, i32) {
    %c0_i32 = arith.constant 0 : i32
    %c0_i32_0 = arith.constant 0 : i32
    %c0_i32_1 = arith.constant 0 : i32
    return %c0_i32, %c0_i32_0 : i32, i32
  }
  func.func @transform_2(%arg0: i32) -> (i32, i32) {
    %c0_i32 = arith.constant 0 : i32
    %c0_i32_0 = arith.constant 0 : i32
    %c0_i32_1 = arith.constant 0 : i32
    return %c0_i32, %c0_i32_0 : i32, i32
  }
  func.func @transform_3(%arg0: i32) -> (i32, i32) {
    %c0_i32 = arith.constant 0 : i32
    %c0_i32_0 = arith.constant 0 : i32
    %c0_i32_1 = arith.constant 0 : i32
    return %c0_i32, %c0_i32_0 : i32, i32
  }
  func.func @transform_4(%arg0: i32) -> (i32, i32) {
    %c0_i32 = arith.constant 0 : i32
    %c0_i32_0 = arith.constant 0 : i32
    %c0_i32_1 = arith.constant 0 : i32
    return %c0_i32, %c0_i32_0 : i32, i32
  }
  func.func @transform_5(%arg0: i32) -> (i32, i32) {
    %c0_i32 = arith.constant 0 : i32
    %c0_i32_0 = arith.constant 0 : i32
    %c0_i32_1 = arith.constant 0 : i32
    return %c0_i32, %c0_i32_0 : i32, i32
  }
  func.func @transform_6(%arg0: i32) -> (i32, i32, i32) {
    %c0_i32 = arith.constant 0 : i32
    %c0_i32_0 = arith.constant 0 : i32
    %c0_i32_1 = arith.constant 0 : i32
    %c0_i32_2 = arith.constant 0 : i32
    return %c0_i32, %c0_i32_0, %c0_i32_1 : i32, i32, i32
  }
  func.func @transform_7(%arg0: i32) -> (i32, i32) {
    %c0_i32 = arith.constant 0 : i32
    %c0_i32_0 = arith.constant 0 : i32
    %c0_i32_1 = arith.constant 0 : i32
    return %c0_i32, %c0_i32_0 : i32, i32
  }
  func.func @transform_8(%arg0: i32) -> (i32, i32, i32) {
    %c0_i32 = arith.constant 0 : i32
    %c0_i32_0 = arith.constant 0 : i32
    %c0_i32_1 = arith.constant 0 : i32
    %c0_i32_2 = arith.constant 0 : i32
    return %c0_i32, %c0_i32_0, %c0_i32_1 : i32, i32, i32
  }
  func.func @transform_9(%arg0: i32) -> (i32, i32) {
    %c0_i32 = arith.constant 0 : i32
    %c0_i32_0 = arith.constant 0 : i32
    %c0_i32_1 = arith.constant 0 : i32
    return %c0_i32, %c0_i32_0 : i32, i32
  }
  func.func @transform_10(%arg0: i32) -> (i32, i32) {
    %c0_i32 = arith.constant 0 : i32
    %c0_i32_0 = arith.constant 0 : i32
    %c0_i32_1 = arith.constant 0 : i32
    return %c0_i32, %c0_i32_0 : i32, i32
  }
  func.func @transform_11(%arg0: i32) -> (i32, i32) {
    %c0_i32 = arith.constant 0 : i32
    %c0_i32_0 = arith.constant 0 : i32
    %c0_i32_1 = arith.constant 0 : i32
    return %c0_i32, %c0_i32_0 : i32, i32
  }
  func.func @transform_12(%arg0: i32) -> (i32, i32, i32) {
    %c0_i32 = arith.constant 0 : i32
    %c0_i32_0 = arith.constant 0 : i32
    %c0_i32_1 = arith.constant 0 : i32
    return %arg0, %c0_i32, %c0_i32_0 : i32, i32, i32
  }
  func.func @transform_13(%arg0: i32) -> (i32, i32, i32) {
    %c0_i32 = arith.constant 0 : i32
    %c0_i32_0 = arith.constant 0 : i32
    %c0_i32_1 = arith.constant 0 : i32
    return %arg0, %c0_i32, %c0_i32_0 : i32, i32, i32
  }
}

</mosaic_0001>

<bundles_post_ra>
// kernel: response_generator_forward.3
= control target key start
LH: loop header
LB: loop body
LE: loop exit
PB: predicated region body
PF: predicated region fallthrough
CT: control target
= control target key end

     0   :  { %s902_s18 = smov 0   ;;  %s1039_s0 = inlined_call_operand.vmem [shape: f32[8,8,32], index: 0, kind: input, shape index: {}]   ;;  %s1040_s1 = inlined_call_operand.vmem [shape: bf16[32,384], index: 1, kind: input, shape index: {}]   ;;  %s1041_s2 = inlined_call_operand.vmem [shape: bf16[128,384], index: 2, kind: input, shape index: {}]   ;;  %s1042_s3 = inlined_call_operand.vmem [shape: f32[1,384], index: 3, kind: input, shape index: {}]   ;;  %s1043_s4 = inlined_call_operand.vmem [shape: f32[1,384], index: 4, kind: input, shape index: {}]   ;;  %s1044_s5 = inlined_call_operand.vmem [shape: f32[8,8,128], index: 5, kind: output, shape index: {}]  }
   0x1 LB: > { %s706_s19 = sadd.s32 4294967295, %s866_s18   ;;  %p710_p0 = scmp.ge.s32.totalorder %s866_s18, 1  ;;  %s866_s18 = sphi %s902_s18, %s15_s18  }
   0x2   : > { %p186_p1 = scmp.lt.s32.totalorder %s866_s18, 9 }
   0x4   : > { %p187_p2 = pnand %p710_p0, %p186_p1 }
   0x5   : > { %p212_p3 = scmp.lt.s32.totalorder (!%p187_p2), %s706_s19, 7  ;;  %p713_p4 = scmp.ne.s32.totalorder (!%p187_p2), %s706_s19, 0 }
   0x6   : > { %190 = sbr.rel (%p187_p2) target bundleno = 322 (0x142), region = 40 }
   0xd   : > { %s213_s20 = scalar_select %p212_p3, %s706_s19, 7 }
   0xe   : > { %224 = sbr.rel (%p713_p4) target bundleno = 21 (0x15), region = 44  ;;  %v868_v0 = vmov (!%p713_p4), 0.0  }
   0xf   : > { %s711_s21 = sshll.u32 %s213_s20, 3  ;;  %225 = vst [vmem:[#allocation2] sm:$0xff] (!%p713_p4), %v868_v0 }
  0x10   : > { %s215_s24 = scalar_lea.vmem %s1039_s0, %s711_s21  ;;  %s916_s27 = scalar_lea.vmem %s1044_s5, %s711_s21 }
  0x15 PF: > { %v810_v1 = vld [vmem:[%s1040_s1 + $0x4] ss:$12 sps:$4 sm:$0xff]   ;;  %v812_v2 = vld [vmem:[%s1040_s1] ss:$12 sps:$4 sm:$0xff]   ;;  %v869_v3 = vmov 0   ;;  %v870_v5 = vmov 0.0   ;;  %v239_v41 = vlaneseq }
  0x16   : > { %322 = vmatprep.mubr.bf16.mxu0 %v869_v3  ;;  %290 = vmatprep.subr.bf16.mxu0 %v810_v1  ;;  %v813_v4 = vld [vmem:[%s1040_s1 + $0x1c] ss:$12 sps:$4 sm:$0xff]   ;;  %v815_v6 = vld [vmem:[%s1040_s1 + $0x18] ss:$12 sps:$4 sm:$0xff]   ;;  %vm871_vm0 = vmmov 0   ;;  %vm286_vm1 = vcmask 261120  }
  0x17   : > { %762 = vmatprep.subr.bf16.mxu1 %v870_v5  ;;  %291 = vmatpush1.bf16.msra.mxu0 %v812_v2  ;;  %v818_v7 = vld [vmem:[%s1041_s2 + $0x4] ss:$12 sps:$4 sm:$0xff]   ;;  %v816_v10 = vld [vmem:[%s1041_s2] ss:$12 sps:$4 sm:$0xff]   ;;  %v821_v11 = vld [vmem:[%s1041_s2 + $0x1c] ss:$12 sps:$4 sm:$0xff]  }
  0x18   : > { %766 = vmatprep.mubr.msk.bf16.mxu1 %vm871_vm0, %v870_v5  ;;  %292 = vmatprep.subr.bf16.mxu0 %v813_v4  ;;  %v226_v8 = vld [vmem:[%s215_s24] sm:$0xff]  ;;  %v828_v12 = vld [vmem:[%s1040_s1 + $0x8] ss:$12 sps:$4 sm:$0xff]   ;;  %v822_v16 = vld [vmem:[%s1041_s2 + $0x30] ss:$12 sps:$4 sm:$0xff]   ;;  %v240_v42 = vshrl.u32 %v239_v41, 7 }
  0x19   : > { %v228_v9 = vpack.c.bf16 %v226_v8, %v226_v8  ;;  %v819_v13 = vld [vmem:[%s1041_s2 + $0x18] ss:$12 sps:$4 sm:$0xff]   ;;  %763 = vmatpush3.bf16.msra.mxu1 %v828_v12  ;;  %v832_v14 = vld [vmem:[%s1040_s1 + $0x20] ss:$12 sps:$4 sm:$0xff]   ;;  %v839_v17 = vld [vmem:[%s1041_s2 + $0x8] ss:$12 sps:$4 sm:$0xff]  }
  0x1a   : > { %v824_v15 = vld [vmem:[%s1041_s2 + $0x34] ss:$12 sps:$4 sm:$0xff]   ;;  %764 = vmatprep.subr.bf16.mxu1 %v870_v5  ;;  %v827_v18 = vld [vmem:[%s1041_s2 + $0x4c] ss:$12 sps:$4 sm:$0xff]   ;;  %v831_v21 = vld [vmem:[%s1041_s2 + $0x64] ss:$12 sps:$4 sm:$0xff]  }
  0x1b   : > { %293 = vmatpush1.bf16.msra.mxu0 %v815_v6  ;;  %v825_v19 = vld [vmem:[%s1041_s2 + $0x48] ss:$12 sps:$4 sm:$0xff]   ;;  %v843_v20 = vld [vmem:[%s1041_s2 + $0x20] ss:$12 sps:$4 sm:$0xff]   ;;  %v844_v23 = vld [vmem:[%s1041_s2 + $0x38] ss:$12 sps:$4 sm:$0xff]  }
  0x1c   : > { %549 = vmatprep.subr.bf16.mxu0 %v818_v7  ;;  %v829_v22 = vld [vmem:[%s1041_s2 + $0x60] ss:$12 sps:$4 sm:$0xff]   ;;  %v835_v24 = vld [vmem:[%s1041_s2 + $0x7c] ss:$12 sps:$4 sm:$0xff]   ;;  %v833_v25 = vld [vmem:[%s1041_s2 + $0x78] ss:$12 sps:$4 sm:$0xff]  }
  0x1d   : > { %765 = vmatpush3.bf16.msra.mxu1 %v832_v14  ;;  %v845_v26 = vld [vmem:[%s1041_s2 + $0x50] ss:$12 sps:$4 sm:$0xff]   ;;  %v838_v27 = vld [vmem:[%s1041_s2 + $0x94] ss:$12 sps:$4 sm:$0xff]   ;;  %v842_v30 = vld [vmem:[%s1041_s2 + $0xac] ss:$12 sps:$4 sm:$0xff]  }
  0x1e   : > { %720 = vmatmul.mubr.msk.bf16.vlgmr.msra.gmra.mrb[0].mxu0 %vm286_vm1, %v228_v9  ;;  %770 = vmatprep.subr.bf16.mxu1 %v870_v5  ;;  %v836_v28 = vld [vmem:[%s1041_s2 + $0x90] ss:$12 sps:$4 sm:$0xff]   ;;  %v846_v29 = vld [vmem:[%s1041_s2 + $0x68] ss:$12 sps:$4 sm:$0xff]   ;;  %v1012_v32 = vld [vmem:[#allocation2] sm:$0xff]  ;;  %v241_v43 = vsub.s32 0, %v240_v42 }
  0x1f   : > { %550 = vmatpush1.bf16.msra.mxu0 %v816_v10  ;;  %581 = vmatprep.mubr.bf16.mxu0 %v869_v3  ;;  %v840_v31 = vld [vmem:[%s1041_s2 + $0xa8] ss:$12 sps:$4 sm:$0xff]   ;;  %v847_v33 = vld [vmem:[%s1041_s2 + $0x80] ss:$12 sps:$4 sm:$0xff]   ;;  %v371_v34 = vpack.c.bf16 %v1012_v32, %v1012_v32  ;;  %v848_v35 = vld [vmem:[%s1041_s2 + $0x98] ss:$12 sps:$4 sm:$0xff]  }
  0x20   : > { %551 = vmatprep.subr.bf16.mxu0 %v821_v11  ;;  %767 = vmatmul.mubr.msk.bf16.vlgmr.msra.gmra.mrb[0].mxu1 %vm286_vm1, %v228_v9  ;;  %v849_v36 = vld [vmem:[%s1041_s2 + $0xb0] ss:$12 sps:$4 sm:$0xff]   ;;  %v404_v44 = vld [vmem:[%s1043_s4] sm:$0x7]  ;;  %v245_v46 = vsub.s32 1, %v240_v42  ;;  %v249_v3 = vsub.s32 2, %v240_v42 }
  0x21   : > { %771 = vmatpush3.bf16.msra.mxu1 %v839_v17  ;;  %786 = vmatprep.mubr.msk.bf16.mxu1 %vm871_vm0, %v870_v5  ;;  %v237_v45 = vld [vmem:[%s1042_s3] sm:$0x7]  ;;  %v409_v48 = vrot.slane %v404_v44, %v241_v43 }
  0x22   : > { %772 = vmatprep.subr.bf16.mxu1 %v870_v5  ;;  %v242_v47 = vrot.slane %v237_v45, %v241_v43  ;;  %v246_v49 = vrot.slane %v237_v45, %v245_v46  ;;  %v413_v50 = vrot.slane %v404_v44, %v245_v46  ;;  %v417_v4 = vrot.slane %v404_v44, %v249_v3 }
  0x23   : > { %552 = vmatpush1.bf16.msra.mxu0 %v819_v13  ;;  %v250_v6 = vrot.slane %v237_v45, %v249_v3 }
  0x24   : > { %553 = vmatprep.subr.bf16.mxu0 %v824_v15  ;;  %v790_v51 = vadd.f32 %v409_v48, %v242_v47  ;;  %v792_v53 = vadd.f32 %v413_v50, %v246_v49 }
  0x25   : > { %773 = vmatpush3.bf16.msra.mxu1 %v843_v20 }
  0x26   : > { %774 = vmatprep.subr.bf16.mxu1 %v870_v5 }
  0x27   : > { %554 = vmatpush1.bf16.msra.mxu0 %v822_v16 }
  0x28   : > { %555 = vmatprep.subr.bf16.mxu0 %v827_v18 }
  0x29   : > { %775 = vmatpush3.bf16.msra.mxu1 %v844_v23 }
  0x2a   : > { %776 = vmatprep.subr.bf16.mxu1 %v870_v5 }
  0x2b   : > { %556 = vmatpush1.bf16.msra.mxu0 %v825_v19 }
  0x2c   : > { %557 = vmatprep.subr.bf16.mxu0 %v831_v21 }
  0x2d   : > { %777 = vmatpush3.bf16.msra.mxu1 %v845_v26 }
  0x2e   : > { %778 = vmatprep.subr.bf16.mxu1 %v870_v5 }
  0x2f   : > { %558 = vmatpush1.bf16.msra.mxu0 %v829_v22 }
  0x30   : > { %559 = vmatprep.subr.bf16.mxu0 %v835_v24 }
  0x31   : > { %779 = vmatpush3.bf16.msra.mxu1 %v846_v29 }
  0x32   : > { %780 = vmatprep.subr.bf16.mxu1 %v870_v5 }
  0x33   : > { %560 = vmatpush1.bf16.msra.mxu0 %v833_v25 }
  0x34   : > { %561 = vmatprep.subr.bf16.mxu0 %v838_v27 }
  0x35   : > { %781 = vmatpush3.bf16.msra.mxu1 %v847_v33 }
  0x36   : > { %782 = vmatprep.subr.bf16.mxu1 %v870_v5 }
  0x37   : > { %562 = vmatpush1.bf16.msra.mxu0 %v836_v28 }
  0x38   : > { %563 = vmatprep.subr.bf16.mxu0 %v842_v30 }
  0x39   : > { %783 = vmatpush3.bf16.msra.mxu1 %v848_v35 }
  0x3a   : > { %784 = vmatprep.subr.bf16.mxu1 %v870_v5 }
  0x3b   : > { %564 = vmatpush1.bf16.msra.mxu0 %v840_v31 }
  0x3d   : > { %785 = vmatpush3.bf16.msra.mxu1 %v849_v36 }
  0x3e   : > { %582 = vmatmul.mubr.bf16.vlgmr.msra.gmra.mrb[0].mxu0 %v371_v34 }
  0x40   : > { %787 = vmatmul.mubr.bf16.vlgmr.msra.gmra.mrb[4].mxu1 %v371_v34 }
  0xf3   : > { %v365_v37 = vpop.f32.mrb[0].mxu1 }
  0xf4   : > { %v768_v38 = vpop.f32.mrb[1].mxu1  ;;  %v366_v10 = vadd.f32 %v365_v37, %v250_v6 }
  0xf5   : > { %v368_v39 = vpop.f32.mrb[2].mxu1 }
  0xf6   : > { %v769_v40 = vpop.f32.mrb[3].mxu1 }
 0x111   : > { %v583_v52 = vpop.f32.mrb[0].mxu0 }
 0x112   : > { %v791_v54 = vadd.f32 %v790_v51, %v583_v52  ;;  %v585_v55 = vpop.f32.mrb[1].mxu0 }
 0x113   : > { %v587_v56 = vpop.f32.mrb[2].mxu0  ;;  %v793_v59 = vadd.f32 %v792_v53, %v585_v55  ;;  %v624_v61 = vpop.f32.mrb[4].mxu1 }
 0x114   : > { %v746_v57 = vmul.f32 -1.442695, %v791_v54  ;;  %v588_v58 = vpop.f32.mrb[3].mxu0  ;;  %v788_v62 = vpop.f32.mrb[5].mxu1  ;;  %v625_v8 = vadd.f32 %v624_v61, %v417_v4 }
 0x115   : > { %v747_v60 = vmul.f32 -1.442695, %v793_v59  ;;  %v627_v63 = vpop.f32.mrb[6].mxu1 }
 0x116   : > { %850 = vpow2.f32 %v746_v57  ;;  %v789_v0 = vpop.f32.mrb[7].mxu1 }
 0x117   : > { %852 = vpow2.f32 %v747_v60 }
 0x120   : > { %v851_v1 = vpop.eup %850 }
 0x121   : > { %v634_v2 = vadd.f32 1.0, %v851_v1  ;;  %v853_v5 = vpop.eup %852 }
 0x122   : > { %v641_v7 = vadd.f32 1.0, %v853_v5 }
 0x123   : > { %854 = vrcp.f32 %v634_v2 }
 0x124   : > { %856 = vrcp.f32 %v641_v7 }
 0x12d   : > { %v855_v9 = vpop.eup %854 }
 0x12e   : > { %v644_v11 = vmul.f32 %v855_v9, %v625_v8  ;;  %v857_v13 = vpop.eup %856 }
 0x12f   : > { %v647_v14 = vsub.f32 1.0, %v857_v13  ;;  %v649_v16 = vmul.f32 %v857_v13, %v1012_v32 }
 0x130   : > { %v645_v12 = vadd.f32 %v644_v11, %v366_v10 }
 0x132   : > { %858 = vtanh.f32 %v645_v12 }
 0x13c   : > { %v859_v15 = vpop.eup %858 }
 0x13d   : > { %v648_v17 = vmul.f32 %v859_v15, %v647_v14 }
 0x13f   : > { %v650_v18 = vadd.f32 %v649_v16, %v648_v17 }
 0x141   : > { %651 = vst [vmem:[#allocation2] sm:$0xff] %v650_v18  ;;  %652 = vst [vmem:[%s916_s27] sm:$0xff] %v650_v18 }
 0x142 PF: > { %s15_s18 = sadd.s32 1, %s866_s18  }
 0x143   : > { %p12_p5 = scmp.ge.s32.totalorder %s15_s18, 10  }
 0x145   :  { %14 = sbr.rel (!%p12_p5) target bundleno = 1 (0x1), region = 74 }

// kernel: response_generator_forward.4
= control target key start
LH: loop header
LB: loop body
LE: loop exit
PB: predicated region body
PF: predicated region fallthrough
CT: control target
= control target key end

     0   :  { %s961_s18 = smov 0   ;;  %s1102_s0 = inlined_call_operand.vmem [shape: f32[5,16,32], index: 0, kind: input, shape index: {}]   ;;  %s1103_s1 = inlined_call_operand.vmem [shape: bf16[32,384], index: 1, kind: input, shape index: {}]   ;;  %s1104_s2 = inlined_call_operand.vmem [shape: bf16[128,384], index: 2, kind: input, shape index: {}]   ;;  %s1105_s3 = inlined_call_operand.vmem [shape: f32[1,384], index: 3, kind: input, shape index: {}]   ;;  %s1106_s4 = inlined_call_operand.vmem [shape: f32[1,384], index: 4, kind: input, shape index: {}]   ;;  %s1107_s5 = inlined_call_operand.vmem [shape: f32[5,16,128], index: 5, kind: output, shape index: {}]  }
   0x1 LB: > { %s745_s19 = sadd.s32 4294967295, %s925_s18   ;;  %p749_p0 = scmp.ge.s32.totalorder %s925_s18, 1  ;;  %s925_s18 = sphi %s961_s18, %s15_s18  }
   0x2   : > { %p187_p1 = scmp.lt.s32.totalorder %s925_s18, 6 }
   0x4   : > { %p188_p2 = pnand %p749_p0, %p187_p1 }
   0x5   : > { %p215_p3 = scmp.lt.s32.totalorder (!%p188_p2), %s745_s19, 4  ;;  %p754_p4 = scmp.ne.s32.totalorder (!%p188_p2), %s745_s19, 0 }
   0x6   : > { %191 = sbr.rel (%p188_p2) target bundleno = 324 (0x144), region = 40 }
   0xd   : > { %s216_s20 = scalar_select %p215_p3, %s745_s19, 4 }
   0xe   : > { %229 = sbr.rel (%p754_p4) target bundleno = 21 (0x15), region = 44  ;;  %v927_v0 = vmov (!%p754_p4), 0.0  }
   0xf   : > { %s793_s21 = sshll.u32 %s216_s20, 4  ;;  %230 = vst [vmem:[#allocation2] sm:$0xff] (!%p754_p4), %v927_v0  ;;  %231 = vst [vmem:[#allocation2 + $0x8] sm:$0xff] (!%p754_p4), %v927_v0 }
  0x10   : > { %s219_s24 = scalar_lea.vmem %s1102_s0, %s793_s21  ;;  %s975_s27 = scalar_lea.vmem %s1107_s5, %s793_s21 }
  0x15 PF: > { %v859_v1 = vld [vmem:[%s1103_s1 + $0x4] ss:$12 sps:$4 sm:$0xff]   ;;  %v861_v2 = vld [vmem:[%s1103_s1] ss:$12 sps:$4 sm:$0xff]   ;;  %v928_v3 = vmov 0   ;;  %v929_v5 = vmov 0.0   ;;  %v247_v43 = vlaneseq }
  0x16   : > { %330 = vmatprep.mubr.bf16.mxu0 %v928_v3  ;;  %298 = vmatprep.subr.bf16.mxu0 %v859_v1  ;;  %v862_v4 = vld [vmem:[%s1103_s1 + $0x1c] ss:$12 sps:$4 sm:$0xff]   ;;  %v864_v6 = vld [vmem:[%s1103_s1 + $0x18] ss:$12 sps:$4 sm:$0xff]   ;;  %vm930_vm0 = vmmov 0   ;;  %vm294_vm1 = vcmask 261120  }
  0x17   : > { %807 = vmatprep.subr.bf16.mxu1 %v929_v5  ;;  %299 = vmatpush1.bf16.msra.mxu0 %v861_v2  ;;  %v867_v7 = vld [vmem:[%s1104_s2 + $0x4] ss:$12 sps:$4 sm:$0xff]   ;;  %v233_v9 = vld [vmem:[%s219_s24 + $0x8] sm:$0xff]  ;;  %v873_v16 = vld [vmem:[%s1104_s2 + $0x34] ss:$12 sps:$4 sm:$0xff]   ;;  %v248_v44 = vshrl.u32 %v247_v43, 7 }
  0x18   : > { %811 = vmatprep.mubr.msk.bf16.mxu1 %vm930_vm0, %v929_v5  ;;  %300 = vmatprep.subr.bf16.mxu0 %v862_v4  ;;  %v232_v8 = vld [vmem:[%s219_s24] sm:$0xff]  ;;  %v870_v12 = vld [vmem:[%s1104_s2 + $0x1c] ss:$12 sps:$4 sm:$0xff]   ;;  %v876_v19 = vld [vmem:[%s1104_s2 + $0x4c] ss:$12 sps:$4 sm:$0xff]  }
  0x19   : > { %v236_v10 = vpack.c.bf16 %v233_v9, %v232_v8  ;;  %v865_v11 = vld [vmem:[%s1104_s2] ss:$12 sps:$4 sm:$0xff]   ;;  %v877_v13 = vld [vmem:[%s1103_s1 + $0x8] ss:$12 sps:$4 sm:$0xff]   ;;  %v868_v14 = vld [vmem:[%s1104_s2 + $0x18] ss:$12 sps:$4 sm:$0xff]  }
  0x1a   : > { %808 = vmatpush3.bf16.msra.mxu1 %v877_v13  ;;  %v881_v15 = vld [vmem:[%s1103_s1 + $0x20] ss:$12 sps:$4 sm:$0xff]   ;;  %v871_v17 = vld [vmem:[%s1104_s2 + $0x30] ss:$12 sps:$4 sm:$0xff]   ;;  %v888_v18 = vld [vmem:[%s1104_s2 + $0x8] ss:$12 sps:$4 sm:$0xff]  }
  0x1b   : > { %301 = vmatpush1.bf16.msra.mxu0 %v864_v6  ;;  %809 = vmatprep.subr.bf16.mxu1 %v929_v5  ;;  %v874_v20 = vld [vmem:[%s1104_s2 + $0x48] ss:$12 sps:$4 sm:$0xff]   ;;  %v892_v21 = vld [vmem:[%s1104_s2 + $0x20] ss:$12 sps:$4 sm:$0xff]   ;;  %v880_v22 = vld [vmem:[%s1104_s2 + $0x64] ss:$12 sps:$4 sm:$0xff]  }
  0x1c   : > { %560 = vmatprep.subr.bf16.mxu0 %v867_v7  ;;  %v878_v23 = vld [vmem:[%s1104_s2 + $0x60] ss:$12 sps:$4 sm:$0xff]   ;;  %v893_v24 = vld [vmem:[%s1104_s2 + $0x38] ss:$12 sps:$4 sm:$0xff]   ;;  %v884_v25 = vld [vmem:[%s1104_s2 + $0x7c] ss:$12 sps:$4 sm:$0xff]  }
  0x1d   : > { %v882_v26 = vld [vmem:[%s1104_s2 + $0x78] ss:$12 sps:$4 sm:$0xff]   ;;  %v894_v27 = vld [vmem:[%s1104_s2 + $0x50] ss:$12 sps:$4 sm:$0xff]   ;;  %v887_v28 = vld [vmem:[%s1104_s2 + $0x94] ss:$12 sps:$4 sm:$0xff]  }
  0x1e   : > { %761 = vmatmul.mubr.msk.bf16.vlgmr.msra.gmra.mrb[0].mxu0 %vm294_vm1, %v236_v10  ;;  %810 = vmatpush3.bf16.msra.mxu1 %v881_v15  ;;  %v885_v29 = vld [vmem:[%s1104_s2 + $0x90] ss:$12 sps:$4 sm:$0xff]   ;;  %v895_v30 = vld [vmem:[%s1104_s2 + $0x68] ss:$12 sps:$4 sm:$0xff]   ;;  %v891_v31 = vld [vmem:[%s1104_s2 + $0xac] ss:$12 sps:$4 sm:$0xff]  }
  0x1f   : > { %561 = vmatpush1.bf16.msra.mxu0 %v865_v11  ;;  %592 = vmatprep.mubr.bf16.mxu0 %v928_v3  ;;  %v889_v32 = vld [vmem:[%s1104_s2 + $0xa8] ss:$12 sps:$4 sm:$0xff]   ;;  %v1071_v33 = vld [vmem:[#allocation2] sm:$0xff]  ;;  %v898_v38 = vld [vmem:[%s1104_s2 + $0xb0] ss:$12 sps:$4 sm:$0xff]   ;;  %v249_v45 = vsub.s32 0, %v248_v44 }
  0x20   : > { %562 = vmatprep.subr.bf16.mxu0 %v870_v12  ;;  %815 = vmatprep.subr.bf16.mxu1 %v929_v5  ;;  %v1073_v34 = vld [vmem:[#allocation2 + $0x8] sm:$0xff]  ;;  %v897_v37 = vld [vmem:[%s1104_s2 + $0x98] ss:$12 sps:$4 sm:$0xff]   ;;  %v415_v46 = vld [vmem:[%s1106_s4] sm:$0x7]  ;;  %v253_v48 = vsub.s32 1, %v248_v44 }
  0x21   : > { %812 = vmatmul.mubr.msk.bf16.vlgmr.msra.gmra.mrb[0].mxu1 %vm294_vm1, %v236_v10  ;;  %v896_v35 = vld [vmem:[%s1104_s2 + $0x80] ss:$12 sps:$4 sm:$0xff]   ;;  %v382_v36 = vpack.c.bf16 %v1073_v34, %v1071_v33  ;;  %v420_v50 = vrot.slane %v415_v46, %v249_v45  ;;  %v257_v11 = vsub.s32 2, %v248_v44 }
  0x22   : > { %816 = vmatpush3.bf16.msra.mxu1 %v888_v18  ;;  %831 = vmatprep.mubr.msk.bf16.mxu1 %vm930_vm0, %v929_v5  ;;  %v245_v47 = vld [vmem:[%s1105_s3] sm:$0x7]  ;;  %v424_v52 = vrot.slane %v415_v46, %v253_v48 }
  0x23   : > { %563 = vmatpush1.bf16.msra.mxu0 %v868_v14  ;;  %817 = vmatprep.subr.bf16.mxu1 %v929_v5  ;;  %v250_v49 = vrot.slane %v245_v47, %v249_v45  ;;  %v254_v51 = vrot.slane %v245_v47, %v253_v48  ;;  %v428_v12 = vrot.slane %v415_v46, %v257_v11 }
  0x24   : > { %564 = vmatprep.subr.bf16.mxu0 %v873_v16  ;;  %v258_v15 = vrot.slane %v245_v47, %v257_v11 }
  0x25   : > { %v835_v53 = vadd.f32 %v420_v50, %v250_v49  ;;  %v837_v55 = vadd.f32 %v424_v52, %v254_v51 }
  0x26   : > { %818 = vmatpush3.bf16.msra.mxu1 %v892_v21 }
  0x27   : > { %565 = vmatpush1.bf16.msra.mxu0 %v871_v17  ;;  %819 = vmatprep.subr.bf16.mxu1 %v929_v5 }
  0x28   : > { %566 = vmatprep.subr.bf16.mxu0 %v876_v19 }
  0x2a   : > { %820 = vmatpush3.bf16.msra.mxu1 %v893_v24 }
  0x2b   : > { %567 = vmatpush1.bf16.msra.mxu0 %v874_v20  ;;  %821 = vmatprep.subr.bf16.mxu1 %v929_v5 }
  0x2c   : > { %568 = vmatprep.subr.bf16.mxu0 %v880_v22 }
  0x2e   : > { %822 = vmatpush3.bf16.msra.mxu1 %v894_v27 }
  0x2f   : > { %569 = vmatpush1.bf16.msra.mxu0 %v878_v23  ;;  %823 = vmatprep.subr.bf16.mxu1 %v929_v5 }
  0x30   : > { %570 = vmatprep.subr.bf16.mxu0 %v884_v25 }
  0x32   : > { %824 = vmatpush3.bf16.msra.mxu1 %v895_v30 }
  0x33   : > { %571 = vmatpush1.bf16.msra.mxu0 %v882_v26  ;;  %825 = vmatprep.subr.bf16.mxu1 %v929_v5 }
  0x34   : > { %572 = vmatprep.subr.bf16.mxu0 %v887_v28 }
  0x36   : > { %826 = vmatpush3.bf16.msra.mxu1 %v896_v35 }
  0x37   : > { %573 = vmatpush1.bf16.msra.mxu0 %v885_v29  ;;  %827 = vmatprep.subr.bf16.mxu1 %v929_v5 }
  0x38   : > { %574 = vmatprep.subr.bf16.mxu0 %v891_v31 }
  0x3a   : > { %828 = vmatpush3.bf16.msra.mxu1 %v897_v37 }
  0x3b   : > { %575 = vmatpush1.bf16.msra.mxu0 %v889_v32  ;;  %829 = vmatprep.subr.bf16.mxu1 %v929_v5 }
  0x3e   : > { %593 = vmatmul.mubr.bf16.vlgmr.msra.gmra.mrb[0].mxu0 %v382_v36  ;;  %830 = vmatpush3.bf16.msra.mxu1 %v898_v38 }
  0x41   : > { %832 = vmatmul.mubr.bf16.vlgmr.msra.gmra.mrb[4].mxu1 %v382_v36 }
  0xf4   : > { %v375_v39 = vpop.f32.mrb[0].mxu1 }
  0xf5   : > { %v813_v40 = vpop.f32.mrb[1].mxu1  ;;  %v376_v20 = vadd.f32 %v375_v39, %v258_v15 }
  0xf6   : > { %v378_v41 = vpop.f32.mrb[2].mxu1 }
  0xf7   : > { %v814_v42 = vpop.f32.mrb[3].mxu1  ;;  %v379_v24 = vadd.f32 %v378_v41, %v258_v15 }
 0x111   : > { %v594_v54 = vpop.f32.mrb[0].mxu0 }
 0x112   : > { %v836_v56 = vadd.f32 %v835_v53, %v594_v54  ;;  %v596_v57 = vpop.f32.mrb[1].mxu0 }
 0x113   : > { %v598_v58 = vpop.f32.mrb[2].mxu0  ;;  %v838_v62 = vadd.f32 %v837_v55, %v596_v57 }
 0x114   : > { %v787_v59 = vmul.f32 -1.442695, %v836_v56  ;;  %v840_v60 = vadd.f32 %v835_v53, %v598_v58  ;;  %v600_v61 = vpop.f32.mrb[3].mxu0  ;;  %v637_v2 = vpop.f32.mrb[4].mxu1 }
 0x115   : > { %v842_v0 = vadd.f32 %v837_v55, %v600_v61  ;;  %v789_v1 = vmul.f32 -1.442695, %v838_v62  ;;  %v833_v3 = vpop.f32.mrb[5].mxu1  ;;  %v638_v17 = vadd.f32 %v637_v2, %v428_v12 }
 0x116   : > { %899 = vpow2.f32 %v787_v59  ;;  %v788_v63 = vmul.f32 -1.442695, %v840_v60  ;;  %v640_v5 = vpop.f32.mrb[6].mxu1 }
 0x117   : > { %v790_v4 = vmul.f32 -1.442695, %v842_v0  ;;  %v834_v6 = vpop.f32.mrb[7].mxu1  ;;  %v641_v22 = vadd.f32 %v640_v5, %v428_v12 }
 0x118   : > { %901 = vpow2.f32 %v788_v63 }
 0x119   : > { %903 = vpow2.f32 %v789_v1 }
 0x11a   : > { %905 = vpow2.f32 %v790_v4 }
 0x120   : > { %v900_v7 = vpop.eup %899 }
 0x121   : > { %v652_v8 = vadd.f32 1.0, %v900_v7 }
 0x122   : > { %v902_v9 = vpop.eup %901 }
 0x123   : > { %907 = vrcp.f32 %v652_v8  ;;  %v653_v10 = vadd.f32 1.0, %v902_v9  ;;  %v904_v13 = vpop.eup %903 }
 0x124   : > { %v906_v14 = vpop.eup %905  ;;  %v666_v16 = vadd.f32 1.0, %v904_v13 }
 0x125   : > { %909 = vrcp.f32 %v653_v10  ;;  %v667_v18 = vadd.f32 1.0, %v906_v14 }
 0x126   : > { %911 = vrcp.f32 %v666_v16 }
 0x127   : > { %913 = vrcp.f32 %v667_v18 }
 0x12d   : > { %v908_v19 = vpop.eup %907 }
 0x12e   : > { %v672_v21 = vmul.f32 %v908_v19, %v638_v17 }
 0x12f   : > { %v910_v23 = vpop.eup %909 }
 0x130   : > { %v674_v25 = vadd.f32 %v672_v21, %v376_v20  ;;  %v673_v26 = vmul.f32 %v910_v23, %v641_v22  ;;  %v912_v28 = vpop.eup %911 }
 0x131   : > { %v914_v29 = vpop.eup %913  ;;  %v678_v30 = vsub.f32 1.0, %v912_v28  ;;  %v682_v32 = vmul.f32 %v912_v28, %v1071_v33 }
 0x132   : > { %915 = vtanh.f32 %v674_v25  ;;  %v675_v27 = vadd.f32 %v673_v26, %v379_v24  ;;  %v679_v35 = vsub.f32 1.0, %v914_v29  ;;  %v683_v38 = vmul.f32 %v914_v29, %v1073_v34 }
 0x134   : > { %917 = vtanh.f32 %v675_v27 }
 0x13c   : > { %v916_v31 = vpop.eup %915 }
 0x13d   : > { %v680_v36 = vmul.f32 %v916_v31, %v678_v30 }
 0x13e   : > { %v918_v37 = vpop.eup %917 }
 0x13f   : > { %v684_v39 = vadd.f32 %v682_v32, %v680_v36  ;;  %v681_v40 = vmul.f32 %v918_v37, %v679_v35 }
 0x141   : > { %686 = vst [vmem:[#allocation2] sm:$0xff] %v684_v39  ;;  %688 = vst [vmem:[%s975_s27] sm:$0xff] %v684_v39  ;;  %v685_v41 = vadd.f32 %v683_v38, %v681_v40 }
 0x143   : > { %687 = vst [vmem:[#allocation2 + $0x8] sm:$0xff] %v685_v41  ;;  %689 = vst [vmem:[%s975_s27 + $0x8] sm:$0xff] %v685_v41 }
 0x144 PF: > { %s15_s18 = sadd.s32 1, %s925_s18  }
 0x145   : > { %p12_p5 = scmp.ge.s32.totalorder %s15_s18, 7  }
 0x147   :  { %14 = sbr.rel (!%p12_p5) target bundleno = 1 (0x1), region = 74 }

// kernel: response_generator_forward.5
= control target key start
LH: loop header
LB: loop body
LE: loop exit
PB: predicated region body
PF: predicated region fallthrough
CT: control target
= control target key end

     0   :  { %s3230_s0 = inlined_call_operand.vmem [shape: f32[6,8,32], index: 0, kind: input, shape index: {}]   ;;  %s3231_s1 = inlined_call_operand.vmem [shape: f32[8,128], index: 1, kind: input, shape index: {}]   ;;  %s3232_s2 = inlined_call_operand.vmem [shape: bf16[32,384], index: 2, kind: input, shape index: {}]   ;;  %s3233_s3 = inlined_call_operand.vmem [shape: bf16[128,384], index: 3, kind: input, shape index: {}]   ;;  %s3234_s4 = inlined_call_operand.vmem [shape: f32[1,384], index: 4, kind: input, shape index: {}]   ;;  %s3235_s5 = inlined_call_operand.vmem [shape: f32[1,384], index: 5, kind: input, shape index: {}]   ;;  %s3236_s6 = inlined_call_operand.vmem [shape: f32[8,10,128], index: 6, kind: input, shape index: {}]   ;;  %s3237_s7 = inlined_call_operand.vmem [shape: f32[8,10], index: 7, kind: input, shape index: {}]   ;;  %s3238_s8 = inlined_call_operand.vmem [shape: f32[8,8,128], index: 8, kind: input, shape index: {}]   ;;  %s3239_s9 = inlined_call_operand.vmem [shape: f32[8,8], index: 9, kind: input, shape index: {}]   ;;  %s3240_s10 = inlined_call_operand.vmem [shape: bf16[384,128], index: 10, kind: input, shape index: {}]   ;;  %s3241_s11 = inlined_call_operand.vmem [shape: f32[1,128], index: 11, kind: input, shape index: {}]   ;;  %s3242_s12 = inlined_call_operand.hbm [shape: f32[6,8,128], index: 12, kind: output, shape index: {0}]   ;;  %s3243_s13 = inlined_call_operand.hbm [shape: f32[6,8,10], index: 13, kind: output, shape index: {1}]  }
   0x1   :  { %3249 = sst [smem:[#allocation14_spill]] %s3230_s0 }
   0x2   :  { %19 = vsyncpa [#allocation4], 0 }
   0x3   :  { %21 = vsyncpa [#allocation4 + $0x1], 0 }
   0x4   :  { %22 = vsyncpa [#allocation6], 0 }
   0x5   :  { %24 = vsyncpa [#allocation6 + $0x1], 0  ;;  %s2565_s25 = smov 0   ;;  %s2567_s26 = smov 0  }
   0x6   :  { %s2569_s27 = smov 0   ;;  %s2571_s28 = smov 0  }
   0x7 LB: > { %3250 = sst [smem:[#allocation9_spill]] %s2479_s26  ;;  %s2586_s29 = sadd.s32 4294967295, %s2487_s28   ;;  %s2487_s28 = sphi %s2571_s28, %s3259_s28   ;;  %s2483_s27 = sphi %s2569_s27, %s3262_s27   ;;  %s2479_s26 = sphi %s2567_s26, %s3261_s26   ;;  %s2475_s25 = sphi %s2565_s25, %s3260_s25  }
   0x8   : > { %3251 = sst [smem:[#allocation10_spill]] %s2483_s27  ;;  %s2054_s30 = sadd.s32 4294967294, %s2487_s28  }
   0x9   : > { %s2590_s14 = sadd.s32 1, %s2487_s28   ;;  %s294_s15 = sadd.s32 1, %s2483_s27 }
   0xa   : > { %3252 = sst [smem:[#allocation11_spill]] %s2590_s14  ;;  %s291_s16 = ssub.s32 %s2487_s28, %s2590_s14 }
   0xb   : > { %p304_p0 = scmp.ne.s32.totalorder %s2483_s27, %s2479_s26  ;;  %p292_p1 = scmp.eq.s32.totalorder %s291_s16, 0 }
   0xc   : > { %p305_p2 = scmp.eq.s32.totalorder %s2586_s29, 5  ;;  %p310_p3 = scmp.ne.s32.totalorder %s2479_s26, %s2475_s25 }
   0xd   : > { %p311_p4 = scmp.eq.s32.totalorder %s2054_s30, 5  ;;  %p2057_p7 = scmp.ge.s32.totalorder %s2487_s28, 1 }
   0xe   : > { %s2601_s17 = scalar_select %p292_p1, %s2483_s27, %s294_s15  }
   0xf   : > { %p2603_p5 = por %p305_p2, %p304_p0  ;;  %p2607_p6 = por %p311_p4, %p310_p3 }
  0x10   : > { %3253 = sst [smem:[#allocation12_spill]] %s2601_s17  ;;  %p395_p8 = scmp.lt.s32.totalorder %s2487_s28, 7 }
  0x11   : > { %s3255_s19 = scalar_select %p2607_p6, 1, 0 }
  0x12   : > { %p396_p9 = pnand %p2057_p7, %p395_p8 }
  0x13   : > { %3256 = sst [smem:[#allocation13_spill]] %s3255_s19  ;;  %s2614_s20 = sand.u32 (!%p396_p9), 1, %s2479_s26  }
  0x14   : > { %399 = sbr.rel (%p396_p9) target bundleno = 1254 (0x4e6), region = 68  ;;  %p443_p10 = scmp.lt.s32.totalorder (!%p396_p9), %s2586_s29, 5 }
  0x15   : > { %s2058_s21 = sshll.u32 (!%p396_p9), %s2614_s20, 3  ;;  %s3257_s0 = sld [smem:[#allocation14_spill]] (!%p396_p9) }
  0x16   : > { %s2622_s16 = scalar_lea.vmem (!%p396_p9), [#allocation3], %s2058_s21  ;;  %s2624_s17 = scalar_lea.vmem (!%p396_p9), [#allocation5], %s2058_s21 }
  0x17   : > { %p2061_p11 = scmp.ne.s32.totalorder (!%p396_p9), %s2586_s29, 0 }
  0x1b   : > { %s444_s22 = scalar_select %p443_p10, %s2586_s29, 5 }
  0x1c   : > { %451 = sbr.rel (%p2061_p11) target bundleno = 35 (0x23), region = 72  ;;  %v452_v0 = vld [vmem:[%s3231_s1] sm:$0xff] (!%p2061_p11) }
  0x1d   : > { %s2060_s23 = sshll.u32 %s444_s22, 3  ;;  %453 = vst [vmem:[#allocation2] sm:$0xff] (!%p2061_p11), %v452_v0 }
  0x1e   : > { %s446_s15 = scalar_lea.vmem %s3257_s0, %s2060_s23 }
  0x23 PF: > { %v2308_v1 = vld [vmem:[%s3233_s3 + $0x4] ss:$12 sps:$4 sm:$0xff]   ;;  %v2310_v2 = vld [vmem:[%s3233_s3] ss:$12 sps:$4 sm:$0xff]   ;;  %v2489_v3 = vmov 0   ;;  %vm514_vm0 = vcmask 261120   ;;  %v467_v37 = vlaneseq }
  0x24   : > { %550 = vmatprep.mubr.bf16.mxu1 %v2489_v3  ;;  %809 = vmatprep.mubr.bf16.mxu0 %v2489_v3  ;;  %v2311_v4 = vld [vmem:[%s3233_s3 + $0x1c] ss:$12 sps:$4 sm:$0xff]   ;;  %v2313_v5 = vld [vmem:[%s3233_s3 + $0x18] ss:$12 sps:$4 sm:$0xff]   ;;  %v2316_v7 = vld [vmem:[%s3232_s2] ss:$12 sps:$4 sm:$0xff]  }
  0x25   : > { %777 = vmatprep.subr.bf16.mxu0 %v2308_v1  ;;  %v2314_v6 = vld [vmem:[%s3232_s2 + $0x4] ss:$12 sps:$4 sm:$0xff]   ;;  %v2317_v8 = vld [vmem:[%s3233_s3 + $0x34] ss:$12 sps:$4 sm:$0xff]   ;;  %v2320_v9 = vld [vmem:[%s3232_s2 + $0x1c] ss:$12 sps:$4 sm:$0xff]  }
  0x26   : > { %778 = vmatpush1.bf16.msra.mxu0 %v2310_v2  ;;  %518 = vmatprep.subr.bf16.mxu1 %v2314_v6  ;;  %v2322_v10 = vld [vmem:[%s3232_s2 + $0x18] ss:$12 sps:$4 sm:$0xff]   ;;  %v2319_v11 = vld [vmem:[%s3233_s3 + $0x30] ss:$12 sps:$4 sm:$0xff]   ;;  %v2326_v15 = vld [vmem:[%s3232_s2 + $0x8] ss:$12 sps:$4 sm:$0xff]  }
  0x27   : > { %779 = vmatprep.subr.bf16.mxu0 %v2311_v4  ;;  %519 = vmatpush1.bf16.msra.mxu1 %v2316_v7  ;;  %v2323_v12 = vld [vmem:[%s3233_s3 + $0x4c] ss:$12 sps:$4 sm:$0xff]   ;;  %v454_v13 = vld [vmem:[%s446_s15] sm:$0xff]  ;;  %v2325_v16 = vld [vmem:[%s3233_s3 + $0x48] ss:$12 sps:$4 sm:$0xff]   ;;  %v2490_v17 = vmov 0.0  }
  0x28   : > { %520 = vmatprep.subr.bf16.mxu1 %v2320_v9  ;;  %v456_v14 = vpack.c.bf16 %v454_v13, %v454_v13  ;;  %v2327_v18 = vld [vmem:[%s3233_s3 + $0x64] ss:$12 sps:$4 sm:$0xff]   ;;  %v2330_v19 = vld [vmem:[%s3232_s2 + $0x20] ss:$12 sps:$4 sm:$0xff]   ;;  %vm2491_vm1 = vmmov 0   ;;  %v2747_v42 = vshrl.u32 %v467_v37, 7 }
  0x29   : > { %v2329_v20 = vld [vmem:[%s3233_s3 + $0x60] ss:$12 sps:$4 sm:$0xff]   ;;  %v2331_v21 = vld [vmem:[%s3233_s3 + $0x7c] ss:$12 sps:$4 sm:$0xff]   ;;  %v2333_v23 = vld [vmem:[%s3233_s3 + $0x78] ss:$12 sps:$4 sm:$0xff]  }
  0x2a   : > { %780 = vmatpush1.bf16.msra.mxu0 %v2313_v5  ;;  %v2336_v22 = vld [vmem:[%s3233_s3 + $0x8] ss:$12 sps:$4 sm:$0xff]   ;;  %v2337_v25 = vld [vmem:[%s3233_s3 + $0x90] ss:$12 sps:$4 sm:$0xff]   ;;  %v2340_v26 = vld [vmem:[%s3233_s3 + $0x20] ss:$12 sps:$4 sm:$0xff]  }
  0x2b   : > { %781 = vmatprep.subr.bf16.mxu0 %v2317_v8  ;;  %521 = vmatpush1.bf16.msra.mxu1 %v2322_v10  ;;  %v2334_v24 = vld [vmem:[%s3233_s3 + $0x94] ss:$12 sps:$4 sm:$0xff]   ;;  %v2338_v27 = vld [vmem:[%s3233_s3 + $0xac] ss:$12 sps:$4 sm:$0xff]   ;;  %v2343_v31 = vld [vmem:[%s3233_s3 + $0x50] ss:$12 sps:$4 sm:$0xff]  }
  0x2c   : > { %2166 = vmatprep.subr.bf16.mxu1 %v2490_v17  ;;  %v2342_v28 = vld [vmem:[%s3233_s3 + $0x38] ss:$12 sps:$4 sm:$0xff]   ;;  %v2341_v29 = vld [vmem:[%s3233_s3 + $0xa8] ss:$12 sps:$4 sm:$0xff]   ;;  %v2345_v34 = vld [vmem:[%s3233_s3 + $0x80] ss:$12 sps:$4 sm:$0xff]  }
  0x2d   : > { %v2715_v30 = vld [vmem:[#allocation2] sm:$0xff]  ;;  %v2344_v33 = vld [vmem:[%s3233_s3 + $0x68] ss:$12 sps:$4 sm:$0xff]   ;;  %v2347_v36 = vld [vmem:[%s3233_s3 + $0xb0] ss:$12 sps:$4 sm:$0xff]   ;;  %v2750_v43 = vsub.s32 0, %v2747_v42 }
  0x2e   : > { %782 = vmatpush1.bf16.msra.mxu0 %v2319_v11  ;;  %2068 = vmatmul.mubr.msk.bf16.vlgmr.msra.gmra.mrb[0].mxu1 %vm514_vm0, %v456_v14  ;;  %v599_v32 = vpack.c.bf16 %v2715_v30, %v2715_v30  ;;  %v2346_v35 = vld [vmem:[%s3233_s3 + $0x98] ss:$12 sps:$4 sm:$0xff]   ;;  %v465_v45 = vld [vmem:[%s3234_s4] sm:$0x7]  ;;  %v2756_v46 = vsub.s32 1, %v2747_v42  ;;  %v2766_v5 = vsub.s32 2, %v2747_v42 }
  0x2f   : > { %783 = vmatprep.subr.bf16.mxu0 %v2323_v12  ;;  %2167 = vmatpush3.bf16.msra.mxu1 %v2326_v15  ;;  %v470_v50 = vrot.slane %v465_v45, %v2750_v43  ;;  %v632_v52 = vld [vmem:[%s3235_s5] sm:$0x7]  ;;  %vm1005_vm2 = vcmask 1041408   ;;  %vm1137_vm3 = vcmask 1041409   ;;  %vm1139_vm4 = vcmask 1042434   ;;  %s2123_s22 = sshll.u32 %s2586_s29, 7 }
  0x30   : > { %2170 = vmatprep.mubr.msk.bf16.mxu1 %vm2491_vm1, %v2490_v17  ;;  %2168 = vmatprep.subr.bf16.mxu1 %v2490_v17  ;;  %v474_v51 = vrot.slane %v465_v45, %v2756_v46  ;;  %v637_v54 = vrot.slane %v632_v52, %v2750_v43  ;;  %v641_v56 = vrot.slane %v632_v52, %v2756_v46  ;;  %vm1141_vm5 = vcmask 1043459   ;;  %s3156_s21 = scalar_lea.hbm %s3243_s13, %s2123_s22  ;;  %s1963_s23 = sshll.u32 %s2624_s17, 4  ;;  %s1964_s23 = int_to_ptr.vmem [resolvable:$true] %s1963_s23 }
  0x31   : > { %v645_v8 = vrot.slane %v632_v52, %v2766_v5  ;;  %v478_v12 = vrot.slane %v465_v45, %v2766_v5  ;;  %v2788_v45 = vld [vmem:[%s3236_s6] sm:$0xff]  ;;  %vm1143_vm6 = vcmask 1044484   ;;  %vm1145_vm7 = vcmask 1045509   ;;  %s1937_s27 = scalar_lea.sflag [#allocation6], %s2614_s20  ;;  %s2393_s14 = scalar_lea.vmem %s1964_s23, 128 }
  0x32   : > { %784 = vmatpush1.bf16.msra.mxu0 %v2325_v16  ;;  %vm1147_vm8 = vcmask 1046534   ;;  %vm1149_vm9 = vcmask 1047559   ;;  %vm1416_vm11 = vcmask 64512   ;;  %vm1072_vm12 = vcmask 130112   ;;  %p2394_p12 = scmp.ne.s32.totalorder %s1964_s23, %s2393_s14  ;;  %s2493_s15 = smov [#allocation5]  }
  0x33   : > { %785 = vmatprep.subr.bf16.mxu0 %v2327_v18  ;;  %2169 = vmatpush3.bf16.msra.mxu1 %v2330_v19  ;;  %vm1153_vm14 = vcmask 80896   ;;  %s2397_s30 = sshll.u32 %s2493_s15, 4  ;;  %s2398_s30 = int_to_ptr.vmem [resolvable:$false] %s2397_s30 }
  0x34   : > { %2174 = vmatprep.subr.bf16.mxu1 %v2490_v17  ;;  %p2395_p13 = pnand %p2394_p12, %p2603_p5  ;;  %s2399_s26 = scalar_lea.vmem %s2398_s30, 256 }
  0x35   : > { %p2400_p1 = scmp.lt.s32.totalorder %s1964_s23, %s2398_s30  ;;  %p2401_p2 = scmp.lt.s32.totalorder %s2399_s26, %s2393_s14 }
  0x36   : > { %786 = vmatpush1.bf16.msra.mxu0 %v2329_v20  ;;  %2171 = vmatmul.mubr.msk.bf16.vlgmr.msra.gmra.mrb[4].mxu1 %vm514_vm0, %v456_v14  ;;  %v2492_v20 = vmov 1966171168   ;;  %p2396_p0 = pneg %p2395_p13 }
  0x37   : > { %787 = vmatprep.subr.bf16.mxu0 %v2331_v21  ;;  %2175 = vmatpush3.bf16.msra.mxu1 %v2336_v22  ;;  %v900_v21 = vunpack.c.l.s4 %v2492_v20  ;;  %p2402_p3 = por %p2401_p2, %p2400_p1 }
  0x38   : > { %2190 = vmatprep.mubr.msk.bf16.mxu1 %vm2491_vm1, %v2490_v17  ;;  %2176 = vmatprep.subr.bf16.mxu1 %v2490_v17 }
  0x39   : > { %p2403_p4 = pnand %p2402_p3, %p2396_p0 }
  0x3a   : > { %788 = vmatpush1.bf16.msra.mxu0 %v2333_v23  ;;  %v901_v23 = vunpack.c.0.s8 %v900_v21 }
  0x3b   : > { %789 = vmatprep.subr.bf16.mxu0 %v2334_v24  ;;  %2177 = vmatpush3.bf16.msra.mxu1 %v2340_v26 }
  0x3c   : > { %2178 = vmatprep.subr.bf16.mxu1 %v2490_v17 }
  0x3e   : > { %790 = vmatpush1.bf16.msra.mxu0 %v2337_v25 }
  0x3f   : > { %791 = vmatprep.subr.bf16.mxu0 %v2338_v27  ;;  %2179 = vmatpush3.bf16.msra.mxu1 %v2342_v28  ;;  %v904_v28 = vsub.s32 %v901_v23, %v2747_v42 }
  0x40   : > { %2180 = vmatprep.subr.bf16.mxu1 %v2490_v17 }
  0x42   : > { %792 = vmatpush1.bf16.msra.mxu0 %v2341_v29 }
  0x43   : > { %2194 = vmatprep.subr.bf16.mxu0 %v2490_v17  ;;  %2181 = vmatpush3.bf16.msra.mxu1 %v2343_v31 }
  0x44   : > { %2182 = vmatprep.subr.bf16.mxu1 %v2490_v17 }
  0x45   : > { %810 = vmatmul.mubr.bf16.vlgmr.msra.gmra.mrb[0].mxu0 %v599_v32 }
  0x46   : > { %2210 = vmatprep.mubr.msk.bf16.mxu0 %vm2491_vm1, %v2490_v17 }
  0x47   : > { %2183 = vmatpush3.bf16.msra.mxu1 %v2344_v33 }
  0x48   : > { %2184 = vmatprep.subr.bf16.mxu1 %v2490_v17 }
  0x4b   : > { %2185 = vmatpush3.bf16.msra.mxu1 %v2345_v34 }
  0x4c   : > { %2186 = vmatprep.subr.bf16.mxu1 %v2490_v17 }
  0x4f   : > { %2187 = vmatpush3.bf16.msra.mxu1 %v2346_v35  ;;  %v2775_v35 = vld [vmem:[%s3238_s8] sm:$0xff] }
  0x50   : > { %2188 = vmatprep.subr.bf16.mxu1 %v2490_v17 }
  0x53   : > { %2189 = vmatpush3.bf16.msra.mxu1 %v2347_v36  ;;  %v2780_v36 = vld [vmem:[%s3236_s6 + $0x8] sm:$0x3] }
  0x54   : > { %2214 = vmatprep.subr.bf16.mxu1 %v2490_v17 }
  0x56   : > { %2191 = vmatmul.mubr.bf16.vlgmr.msra.gmra.mrb[8].mxu1 %v599_v32 }
  0x57   : > { %2230 = vmatprep.mubr.msk.bf16.mxu1 %vm2491_vm1, %v2490_v17 }
 0x101   : > { %v552_v38 = vpop.f32.mrb[0].mxu1 }
 0x102   : > { %v554_v39 = vpop.f32.mrb[1].mxu1  ;;  %v553_v53 = vadd.f32 %v552_v38, %v470_v50 }
 0x103   : > { %v556_v40 = vpop.f32.mrb[2].mxu1  ;;  %v555_v55 = vadd.f32 %v554_v39, %v474_v51  ;;  %v2795_v51 = vld [vmem:[%s3238_s8 + $0x10] sm:$0xff] }
 0x104   : > { %v557_v41 = vpop.f32.mrb[3].mxu1  ;;  %v2255_v57 = vadd.f32 %v637_v54, %v553_v53 }
 0x105   : > { %v2258_v59 = vadd.f32 %v641_v56, %v555_v55  ;;  %v2803_v56 = vld [vmem:[%s3238_s8 + $0x8] sm:$0xff] }
 0x109   : > { %v593_v44 = vpop.f32.mrb[4].mxu1 }
 0x10a   : > { %v2172_v47 = vpop.f32.mrb[5].mxu1  ;;  %v594_v16 = vadd.f32 %v593_v44, %v478_v12 }
 0x10b   : > { %v596_v48 = vpop.f32.mrb[6].mxu1 }
 0x10c   : > { %v2173_v49 = vpop.f32.mrb[7].mxu1 }
 0x118   : > { %v811_v58 = vpop.f32.mrb[0].mxu0 }
 0x119   : > { %v2256_v60 = vadd.f32 %v2255_v57, %v811_v58  ;;  %v813_v61 = vpop.f32.mrb[1].mxu0 }
 0x11a   : > { %v2259_v62 = vadd.f32 %v2258_v59, %v813_v61  ;;  %v815_v63 = vpop.f32.mrb[2].mxu0  ;;  %v2809_v59 = vld [vmem:[%s3238_s8 + $0x18] sm:$0xff] }
 0x11b   : > { %v2094_v0 = vmul.f32 -1.442695, %v2256_v60  ;;  %v816_v1 = vpop.f32.mrb[3].mxu0 }
 0x11c   : > { %v2095_v2 = vmul.f32 -1.442695, %v2259_v62 }
 0x11d   : > { %2372 = vpow2.f32 %v2094_v0  ;;  %v2817_v0 = vld [vmem:[%s3238_s8 + $0x20] sm:$0xff] }
 0x11e   : > { %2374 = vpow2.f32 %v2095_v2 }
 0x127   : > { %v2373_v3 = vpop.eup %2372 }
 0x128   : > { %v862_v4 = vadd.f32 1.0, %v2373_v3  ;;  %v2375_v10 = vpop.eup %2374  ;;  %v2823_v3 = vld [vmem:[%s3238_s8 + $0x28] sm:$0xff] }
 0x129   : > { %v852_v6 = vpop.f32.mrb[8].mxu1  ;;  %v869_v13 = vadd.f32 1.0, %v2375_v10  ;;  %v2837_v10 = vld [vmem:[%s3238_s8 + $0x38] sm:$0xff] }
 0x12a   : > { %2376 = vrcp.f32 %v862_v4  ;;  %v2192_v7 = vpop.f32.mrb[9].mxu1  ;;  %v853_v14 = vadd.f32 %v852_v6, %v645_v8  ;;  %v2831_v8 = vld [vmem:[%s3238_s8 + $0x30] sm:$0xff] }
 0x12b   : > { %v855_v9 = vpop.f32.mrb[10].mxu1  ;;  %2378 = vrcp.f32 %v869_v13 }
 0x12c   : > { %v2193_v11 = vpop.f32.mrb[11].mxu1 }
 0x12d   : > { %v2842_v11 = vld [vmem:[%s3236_s6 + $0x18] sm:$0x3] }
 0x134   : > { %v2377_v15 = vpop.eup %2376 }
 0x135   : > { %v872_v18 = vmul.f32 %v2377_v15, %v853_v14  ;;  %v2379_v22 = vpop.eup %2378  ;;  %v2849_v14 = vld [vmem:[%s3236_s6 + $0x10] sm:$0xff] }
 0x136   : > { %v875_v24 = vsub.f32 1.0, %v2379_v22  ;;  %v877_v26 = vmul.f32 %v2379_v22, %v2715_v30  ;;  %v2868_v22 = vld [vmem:[%s3236_s6 + $0x38] sm:$0x3] }
 0x137   : > { %v873_v19 = vadd.f32 %v872_v18, %v594_v16  ;;  %v2855_v16 = vld [vmem:[%s3236_s6 + $0x28] sm:$0x3] }
 0x139   : > { %2380 = vtanh.f32 %v873_v19  ;;  %v2861_v19 = vld [vmem:[%s3236_s6 + $0x20] sm:$0xff] }
 0x143   : > { %v2381_v25 = vpop.eup %2380 }
 0x144   : > { %v876_v27 = vmul.f32 %v2381_v25, %v875_v24  ;;  %v2874_v24 = vld [vmem:[%s3236_s6 + $0x30] sm:$0xff] }
 0x146   : > { %v878_v29 = vadd.f32 %v877_v26, %v876_v27  ;;  %v2881_v27 = vld [vmem:[%s3236_s6 + $0x48] sm:$0x3] }
 0x148   : > { %v905_v31 = vrot.slane %v878_v29, %v904_v28  ;;  %879 = vst [vmem:[#allocation2] sm:$0xff] %v878_v29  ;;  %v898_v32 = vcombine.high %v878_v29, %v878_v29  ;;  %v2887_v29 = vld [vmem:[%s3236_s6 + $0x40] sm:$0xff] }
 0x14a   : > { %v921_v33 = vrot.slane %v905_v31, %v904_v28  ;;  %v913_v34 = vcombine.high %v905_v31, %v905_v31  ;;  %v912_v30 = vrot.slane %v898_v32, %v904_v28 }
 0x14c   : > { %v950_v38 = vrot.slane %v921_v33, %v2750_v43  ;;  %v943_v39 = vcombine.high %v921_v33, %v921_v33  ;;  %v935_v40 = vrot.slane %v913_v34, %v904_v28  ;;  %v914_v49 = vcombine.high %v912_v30, %v912_v30  ;;  %v2894_v33 = vld [vmem:[%s3236_s6 + $0x58] sm:$0x3] }
 0x14d   : > { %v928_v54 = vrot.slane %v912_v30, %v904_v28  ;;  %v2900_v30 = vld [vmem:[%s3236_s6 + $0x50] sm:$0xff] }
 0x14e   : > { %v1342_v41 = vmul.f32 %v2775_v35, %v950_v38  ;;  %v988_v44 = vmul.f32 %v950_v38, %v2780_v36  ;;  %v958_v47 = vrot.slane %v943_v39, %v2750_v43  ;;  %v945_v48 = vcombine.high %v935_v40, %v935_v40 }
 0x14f   : > { %v987_v52 = vmul.f32 %v950_v38, %v2788_v45  ;;  %v954_v53 = vrot.slane %v935_v40, %v2750_v43  ;;  %v942_v58 = vrot.slane %v914_v49, %v904_v28  ;;  %v966_v61 = vrot.slane %v928_v54, %v2750_v43  ;;  %v2907_v40 = vld [vmem:[%s3236_s6 + $0x68] sm:$0x3]  ;;  %v2920_v49 = vld [vmem:[%s3236_s6 + $0x78] sm:$0x3] }
 0x150   : > { %1350 = vadd.xlane.f32.xlu0 %v1342_v41  ;;  %v1006_v50 = vsel %vm1005_vm2, %v988_v44, 0.0  ;;  %v1344_v55 = vmul.f32 %v2795_v51, %v958_v47  ;;  %v962_v57 = vrot.slane %v945_v48, %v2750_v43  ;;  %v944_v62 = vcombine.high %v928_v54, %v928_v54  ;;  %v2913_v44 = vld [vmem:[%s3236_s6 + $0x60] sm:$0xff] }
 0x151   : > { %1007 = vadd.xlane.f32.xlu1 %v1006_v50  ;;  %v1343_v60 = vmul.f32 %v2803_v56, %v954_v53  ;;  %v970_v1 = vrot.slane %v942_v58, %v2750_v43  ;;  %v946_v2 = vcombine.high %v942_v58, %v942_v58  ;;  %v1346_v4 = vmul.f32 %v2817_v0, %v966_v61 }
 0x152   : > { %v1345_v63 = vmul.f32 %v2809_v59, %v962_v57  ;;  %v974_v6 = vrot.slane %v944_v62, %v2750_v43  ;;  %v990_v15 = vmul.f32 %v954_v53, %v2842_v11  ;;  %v989_v18 = vmul.f32 %v954_v53, %v2849_v14 }
 0x153   : > { %v1347_v7 = vmul.f32 %v2823_v3, %v970_v1  ;;  %v978_v9 = vrot.slane %v946_v2, %v2750_v43  ;;  %v992_v21 = vmul.f32 %v958_v47, %v2855_v16  ;;  %v991_v23 = vmul.f32 %v958_v47, %v2861_v19 }
 0x154   : > { %1003 = vadd.xlane.f32.xlu0 %v987_v52  ;;  %v1348_v12 = vmul.f32 %v2831_v8, %v974_v6  ;;  %v1011_v20 = vsel %vm1005_vm2, %v990_v15, 0.0  ;;  %v994_v26 = vmul.f32 %v962_v57, %v2868_v22  ;;  %v993_v28 = vmul.f32 %v962_v57, %v2874_v24  ;;  %v2926_v52 = vld [vmem:[%s3236_s6 + $0x70] sm:$0xff] }
 0x155   : > { %1354 = vadd.xlane.f32.xlu1 %v1344_v55  ;;  %v1349_v13 = vmul.f32 %v2837_v10, %v978_v9  ;;  %v1016_v25 = vsel %vm1005_vm2, %v992_v21, 0.0  ;;  %v996_v32 = vmul.f32 %v966_v61, %v2881_v27  ;;  %v995_v34 = vmul.f32 %v966_v61, %v2887_v29 }
 0x156   : > { %v1021_v31 = vsel %vm1005_vm2, %v994_v26, 0.0  ;;  %v998_v39 = vmul.f32 %v970_v1, %v2894_v33  ;;  %v997_v41 = vmul.f32 %v970_v1, %v2900_v30  ;;  %v1000_v48 = vmul.f32 %v974_v6, %v2907_v40  ;;  %v1341_v26 = vld [vmem:[%s3239_s9] sm:$0xff] }
 0x157   : > { %v1026_v38 = vsel %vm1005_vm2, %v996_v32, 0.0  ;;  %v999_v50 = vmul.f32 %v974_v6, %v2913_v44  ;;  %v1002_v54 = vmul.f32 %v978_v9, %v2920_v49  ;;  %v1001_v55 = vmul.f32 %v978_v9, %v2926_v52 }
 0x158   : > { %1352 = vadd.xlane.f32.xlu0 %v1343_v60  ;;  %v1031_v47 = vsel %vm1005_vm2, %v998_v39, 0.0  ;;  %v1036_v53 = vsel %vm1005_vm2, %v1000_v48, 0.0  ;;  %v1062_v60 = vand.u32 127, %v467_v37  ;;  %vm1366_vm10 = vcmp.gt.f32.partialorder %v1341_v26, 0.5 }
 0x159   : > { %1356 = vadd.xlane.f32.xlu1 %v1345_v63  ;;  %v1041_v57 = vsel %vm1005_vm2, %v1002_v54, 0.0 }
 0x15a   : > { %v2938_v63 = vsub.s32 %v1062_v60, %v2747_v42 }
 0x15c   : > { %1358 = vadd.xlane.f32.xlu0 %v1346_v4 }
 0x15d   : > { %1360 = vadd.xlane.f32.xlu1 %v1347_v7 }
 0x160   : > { %1362 = vadd.xlane.f32.xlu0 %v1348_v12 }
 0x161   : > { %1364 = vadd.xlane.f32.xlu1 %v1349_v13 }
 0x164   : > { %1009 = vadd.xlane.f32.xlu0 %v989_v18 }
 0x165   : > { %1012 = vadd.xlane.f32.xlu1 %v1011_v20 }
 0x168   : > { %1014 = vadd.xlane.f32.xlu0 %v991_v23 }
 0x169   : > { %1017 = vadd.xlane.f32.xlu1 %v1016_v25 }
 0x16c   : > { %1019 = vadd.xlane.f32.xlu0 %v993_v28 }
 0x16d   : > { %1022 = vadd.xlane.f32.xlu1 %v1021_v31 }
 0x170   : > { %1024 = vadd.xlane.f32.xlu0 %v995_v34 }
 0x171   : > { %1027 = vadd.xlane.f32.xlu1 %v1026_v38 }
 0x174   : > { %1029 = vadd.xlane.f32.xlu0 %v997_v41 }
 0x175   : > { %1032 = vadd.xlane.f32.xlu1 %v1031_v47 }
 0x178   : > { %1034 = vadd.xlane.f32.xlu0 %v999_v50 }
 0x179   : > { %1037 = vadd.xlane.f32.xlu1 %v1036_v53 }
 0x17c   : > { %1039 = vadd.xlane.f32.xlu0 %v1001_v55 }
 0x17d   : > { %1042 = vadd.xlane.f32.xlu1 %v1041_v57 }
 0x1dd   : > { %v1351_v58 = vpop.xlane.xlu0 %1350 }
 0x1de   : > { %v2933_v61 = vpop.xlane.xlu1 %1007  ;;  %v1378_v4 = vrot.slane %v1351_v58, %v2938_v63 }
 0x1e1   : > { %v2935_v62 = vpop.xlane.xlu0 %1003 }
 0x1e2   : > { %v1355_v1 = vpop.xlane.xlu1 %1354 }
 0x1e3   : > { %v1386_v9 = vrot.slane %v1355_v1, %v2938_v63  ;;  %v1067_v1 = vadd.s32 4294967288, %v1062_v60 }
 0x1e5   : > { %v1353_v2 = vpop.xlane.xlu0 %1352 }
 0x1e6   : > { %v1382_v6 = vrot.slane %v1353_v2, %v2938_v63  ;;  %v1357_v7 = vpop.xlane.xlu1 %1356 }
 0x1e7   : > { %v1390_v37 = vrot.slane %v1357_v7, %v2938_v63 }
 0x1e8   : > { %v1407_v12 = vsel %vm1137_vm3, %v1382_v6, %v1378_v4  ;;  %v1070_v6 = vsub.s32 %v1067_v1, %v2747_v42 }
 0x1e9   : > { %v1408_v13 = vsel %vm1139_vm4, %v1386_v9, %v1407_v12  ;;  %v1359_v15 = vpop.xlane.xlu0 %1358 }
 0x1ea   : > { %v1409_v18 = vsel %vm1141_vm5, %v1390_v37, %v1408_v13  ;;  %v1394_v20 = vrot.slane %v1359_v15, %v2938_v63  ;;  %v1361_v21 = vpop.xlane.xlu1 %1360 }
 0x1eb   : > { %v1398_v23 = vrot.slane %v1361_v21, %v2938_v63 }
 0x1ec   : > { %v1410_v25 = vsel %vm1143_vm6, %v1394_v20, %v1409_v18  ;;  %v1066_v18 = vrot.slane %v2935_v62, %v2938_v63 }
 0x1ed   : > { %v1363_v28 = vpop.xlane.xlu0 %1362  ;;  %v1411_v34 = vsel %vm1145_vm7, %v1398_v23, %v1410_v25  ;;  %v1071_v25 = vrot.slane %v2933_v61, %v1070_v6 }
 0x1ee   : > { %v1402_v31 = vrot.slane %v1363_v28, %v2938_v63  ;;  %v1365_v32 = vpop.xlane.xlu1 %1364 }
 0x1ef   : > { %v1406_v38 = vrot.slane %v1365_v32, %v2938_v63 }
 0x1f0   : > { %v1412_v39 = vsel %vm1147_vm8, %v1402_v31, %v1411_v34 }
 0x1f1   : > { %v1010_v41 = vpop.xlane.xlu0 %1009  ;;  %v1413_v47 = vsel %vm1149_vm9, %v1406_v38, %v1412_v39  ;;  %v1073_v39 = vsel %vm1072_vm12, %v1071_v25, %v1066_v18 }
 0x1f2   : > { %v1013_v48 = vpop.xlane.xlu1 %1012  ;;  %v1415_v50 = vsel %vm1366_vm10, %v1413_v47, -1e+09  ;;  %v1077_v7 = vrot.slane %v1010_v41, %v2938_v63 }
 0x1f3   : > { %v1417_v53 = vsel %vm1416_vm11, %v1415_v50, -inf  ;;  %v1081_v9 = vrot.slane %v1013_v48, %v1070_v6 }
 0x1f4   : > { %1418 = vmax.xlane.f32.xlu0 %v1417_v53 }
 0x1f5   : > { %v1015_v54 = vpop.xlane.xlu0 %1014  ;;  %v1082_v26 = vsel %vm1072_vm12, %v1081_v9, %v1077_v7 }
 0x1f6   : > { %v1018_v55 = vpop.xlane.xlu1 %1017  ;;  %v1086_v12 = vrot.slane %v1015_v54, %v2938_v63  ;;  %v1138_v48 = vsel %vm1137_vm3, %v1082_v26, %v1073_v39 }
 0x1f7   : > { %v1090_v13 = vrot.slane %v1018_v55, %v1070_v6 }
 0x1f9   : > { %v1020_v57 = vpop.xlane.xlu0 %1019  ;;  %v1091_v34 = vsel %vm1072_vm12, %v1090_v13, %v1086_v12 }
 0x1fa   : > { %v1023_v58 = vpop.xlane.xlu1 %1022  ;;  %v1095_v20 = vrot.slane %v1020_v57, %v2938_v63  ;;  %v1140_v53 = vsel %vm1139_vm4, %v1091_v34, %v1138_v48  ;;  %v896_v57 = vld [vmem:[%s3237_s7] sm:$0xff]  ;;  %v2349_v48 = vld [vmem:[%s3240_s10 + $0x48] sm:$0xff]  }
 0x1fb   : > { %v1099_v21 = vrot.slane %v1023_v58, %v1070_v6  ;;  %vm1044_vm13 = vcmp.gt.f32.partialorder %v896_v57, 0.5  ;;  %v2350_v57 = vld [vmem:[%s3240_s10 + $0x50] sm:$0xff]  }
 0x1fd   : > { %v1025_v2 = vpop.xlane.xlu0 %1024  ;;  %v1100_v41 = vsel %vm1072_vm12, %v1099_v21, %v1095_v20 }
 0x1fe   : > { %v1028_v4 = vpop.xlane.xlu1 %1027  ;;  %v1104_v60 = vrot.slane %v1025_v2, %v2938_v63  ;;  %v1142_v58 = vsel %vm1141_vm5, %v1100_v41, %v1140_v53 }
 0x1ff   : > { %v1108_v23 = vrot.slane %v1028_v4, %v1070_v6 }
 0x201   : > { %v1030_v37 = vpop.xlane.xlu0 %1029  ;;  %v1109_v61 = vsel %vm1072_vm12, %v1108_v23, %v1104_v60 }
 0x202   : > { %v1033_v15 = vpop.xlane.xlu1 %1032  ;;  %v1113_v28 = vrot.slane %v1030_v37, %v2938_v63  ;;  %v1144_v7 = vsel %vm1143_vm6, %v1109_v61, %v1142_v58 }
 0x203   : > { %v1117_v31 = vrot.slane %v1033_v15, %v1070_v6 }
 0x205   : > { %v1035_v32 = vpop.xlane.xlu0 %1034  ;;  %v1118_v54 = vsel %vm1072_vm12, %v1117_v31, %v1113_v28 }
 0x206   : > { %v1122_v38 = vrot.slane %v1035_v32, %v2938_v63  ;;  %v1038_v62 = vpop.xlane.xlu1 %1037  ;;  %v1146_v37 = vsel %vm1145_vm7, %v1118_v54, %v1144_v7  ;;  %v1200_v54 = vsub.s32 3, %v2747_v42 }
 0x207   : > { %v1126_v47 = vrot.slane %v1038_v62, %v1070_v6 }
 0x209   : > { %v1040_v55 = vpop.xlane.xlu0 %1039  ;;  %v1127_v1 = vsel %vm1072_vm12, %v1126_v47, %v1122_v38  ;;  %v1211_v47 = vsub.s32 4, %v2747_v42 }
 0x20a   : > { %v1131_v2 = vrot.slane %v1040_v55, %v2938_v63  ;;  %v1043_v4 = vpop.xlane.xlu1 %1042  ;;  %v1148_v13 = vsel %vm1147_vm8, %v1127_v1, %v1146_v37  ;;  %v1233_v55 = vsub.s32 6, %v2747_v42  ;;  %v2352_v37 = vld [vmem:[%s3240_s10 + $0x60] sm:$0xff]  }
 0x20b   : > { %v1135_v9 = vrot.slane %v1043_v4, %v1070_v6  ;;  %v2351_v4 = vld [vmem:[%s3240_s10 + $0x58] sm:$0xff]  }
 0x20d   : > { %v1136_v12 = vsel %vm1072_vm12, %v1135_v9, %v1131_v2  ;;  %v1222_v2 = vsub.s32 5, %v2747_v42  ;;  %v1244_v9 = vsub.s32 7, %v2747_v42  ;;  %v2369_v42 = vld [vmem:[%s3240_s10 + $0x28] sm:$0xff]  }
 0x20e   : > { %v1150_v15 = vsel %vm1149_vm9, %v1136_v12, %v1148_v13 }
 0x20f   : > { %v1152_v18 = vsel %vm1044_vm13, %v1150_v15, -1e+09  ;;  %v2353_v15 = vld [vmem:[%s3240_s10 + $0x68] sm:$0xff]  }
 0x210   : > { %v1154_v20 = vsel %vm1153_vm14, %v1152_v18, -inf }
 0x211   : > { %1155 = vmax.xlane.f32.xlu1 %v1154_v20  ;;  %v2355_v20 = vld [vmem:[%s3240_s10 + $0x78] sm:$0xff]  }
 0x281   : > { %v1419_v21 = vpop.xlane.xlu0 %1418 }
 0x282   : > { %v1420_v63 = vsub.f32 %v1415_v50, %v1419_v21  ;;  %v2348_v50 = vld [vmem:[%s3240_s10 + $0x40] sm:$0xff]  }
 0x283   : > { %2195 = vmatpush3.bf16.msra.mxu0 %v2348_v50  ;;  %v2370_v50 = vld [vmem:[%s3240_s10 + $0x30] sm:$0xff]  }
 0x284   : > { %v1421_v60 = vmul.f32 1.442695, %v1420_v63  ;;  %2196 = vmatprep.subr.bf16.mxu0 %v2490_v17 }
 0x286   : > { %2382 = vpow2.f32 %v1421_v60 }
 0x287   : > { %2197 = vmatpush3.bf16.msra.mxu0 %v2349_v48 }
 0x288   : > { %2198 = vmatprep.subr.bf16.mxu0 %v2490_v17 }
 0x28b   : > { %2199 = vmatpush3.bf16.msra.mxu0 %v2350_v57 }
 0x28c   : > { %2200 = vmatprep.subr.bf16.mxu0 %v2490_v17 }
 0x28f   : > { %2201 = vmatpush3.bf16.msra.mxu0 %v2351_v4 }
 0x290   : > { %v2383_v23 = vpop.eup %2382  ;;  %2202 = vmatprep.subr.bf16.mxu0 %v2490_v17 }
 0x291   : > { %v1423_v6 = vsel %vm1416_vm11, %v2383_v23, 0.0 }
 0x292   : > { %1424 = vadd.xlane.f32.xlu0 %v1423_v6 }
 0x293   : > { %2203 = vmatpush3.bf16.msra.mxu0 %v2352_v37 }
 0x294   : > { %2204 = vmatprep.subr.bf16.mxu0 %v2490_v17 }
 0x297   : > { %2205 = vmatpush3.bf16.msra.mxu0 %v2353_v15 }
 0x298   : > { %2206 = vmatprep.subr.bf16.mxu0 %v2490_v17 }
 0x29e   : > { %v1156_v25 = vpop.xlane.xlu1 %1155 }
 0x29f   : > { %v1157_v26 = vsub.f32 %v1152_v18, %v1156_v25  ;;  %v2354_v18 = vld [vmem:[%s3240_s10 + $0x70] sm:$0xff]  }
 0x2a0   : > { %2207 = vmatpush3.bf16.msra.mxu0 %v2354_v18 }
 0x2a1   : > { %v1158_v28 = vmul.f32 1.442695, %v1157_v26  ;;  %2208 = vmatprep.subr.bf16.mxu0 %v2490_v17  ;;  %v2360_v26 = vld [vmem:[%s3240_s10] sm:$0xff]  }
 0x2a2   : > { %2215 = vmatpush3.bf16.msra.mxu1 %v2360_v26 }
 0x2a3   : > { %2384 = vpow2.f32 %v1158_v28  ;;  %2216 = vmatprep.subr.bf16.mxu1 %v2490_v17 }
 0x2a4   : > { %2209 = vmatpush3.bf16.msra.mxu0 %v2355_v20 }
 0x2a5   : > { %2234 = vmatprep.subr.bf16.mxu0 %v2490_v17 }
 0x2ad   : > { %v2385_v31 = vpop.eup %2384 }
 0x2ae   : > { %v1160_v32 = vsel %vm1153_vm14, %v2385_v31, 0.0 }
 0x2af   : > { %1161 = vadd.xlane.f32.xlu1 %v1160_v32  ;;  %v2366_v32 = vld [vmem:[%s3240_s10 + $0x18] sm:$0xff]  }
 0x31f   : > { %v1425_v34 = vpop.xlane.xlu0 %1424 }
 0x320   : > { %2386 = vrcp.f32 %v1425_v34 }
 0x32a   : > { %v2387_v38 = vpop.eup %2386 }
 0x32b   : > { %v1427_v62 = vmul.f32 %v2387_v38, %v2383_v23  ;;  %v2368_v38 = vld [vmem:[%s3240_s10 + $0x20] sm:$0xff]  }
 0x32d   : > { %v1438_v39 = vrot.slane %v1427_v62, %v2756_v46  ;;  %v1431_v41 = vrot.slane %v1427_v62, %v2750_v43  ;;  %v1445_v61 = vrot.slane %v1427_v62, %v2766_v5  ;;  %v1459_v53 = vrot.slane %v1427_v62, %v1211_v47 }
 0x32e   : > { %v1452_v58 = vrot.slane %v1427_v62, %v1200_v54  ;;  %v1473_v1 = vrot.slane %v1427_v62, %v1233_v55  ;;  %v1466_v7 = vrot.slane %v1427_v62, %v1222_v2  ;;  %v1480_v13 = vrot.slane %v1427_v62, %v1244_v9  ;;  %v2371_v62 = vld [vmem:[%s3240_s10 + $0x38] sm:$0xff]  }
 0x32f   : > { %1440 = vbcast.lane.b32.xlu1 %v1438_v39, 256  ;;  %1433 = vbcast.lane.b32.xlu0 %v1431_v41, 256 }
 0x333   : > { %1447 = vbcast.lane.b32.xlu1 %v1445_v61, 256  ;;  %1461 = vbcast.lane.b32.xlu0 %v1459_v53, 256 }
 0x337   : > { %1454 = vbcast.lane.b32.xlu1 %v1452_v58, 256  ;;  %1475 = vbcast.lane.b32.xlu0 %v1473_v1, 256 }
 0x33b   : > { %1468 = vbcast.lane.b32.xlu1 %v1466_v7, 256 }
 0x33c   : > { %v1162_v12 = vpop.xlane.xlu1 %1161 }
 0x33d   : > { %2388 = vrcp.f32 %v1162_v12 }
 0x33f   : > { %1482 = vbcast.lane.b32.xlu1 %v1480_v13, 256 }
 0x347   : > { %v2389_v21 = vpop.eup %2388 }
 0x348   : > { %v1164_v63 = vmul.f32 %v2389_v21, %v2385_v31 }
 0x34a   : > { %1930 = vst.msk [vmem:[%s2624_s17] sm:$0xff] %vm1153_vm14, %v1164_v63  ;;  %v1179_v60 = vrot.slane %v1164_v63, %v2756_v46  ;;  %v1168_v23 = vrot.slane %v1164_v63, %v2750_v43  ;;  %v1190_v6 = vrot.slane %v1164_v63, %v2766_v5  ;;  %v1201_v25 = vrot.slane %v1164_v63, %v1200_v54  ;;  %v2362_v43 = vld [vmem:[%s3240_s10 + $0x8] sm:$0xff]   ;;  %v2364_v5 = vld [vmem:[%s3240_s10 + $0x10] sm:$0xff]  }
 0x34b   : > { %v1212_v28 = vrot.slane %v1164_v63, %v1211_v47  ;;  %2217 = vmatpush3.bf16.msra.mxu1 %v2362_v43  ;;  %v1223_v46 = vrot.slane %v1164_v63, %v1222_v2  ;;  %v1234_v31 = vrot.slane %v1164_v63, %v1233_v55  ;;  %v1245_v34 = vrot.slane %v1164_v63, %v1244_v9 }
 0x34c   : > { %1185 = vbcast.lane.b32.xlu1 %v1179_v60, 264  ;;  %1174 = vbcast.lane.b32.xlu0 %v1168_v23, 264 }
 0x34d   : > { %2218 = vmatprep.subr.bf16.mxu1 %v2490_v17 }
 0x34f   : > { %2219 = vmatpush3.bf16.msra.mxu1 %v2364_v5 }
 0x350   : > { %1181 = vbcast.lane.b32.xlu1 %v1179_v60, 256  ;;  %1170 = vbcast.lane.b32.xlu0 %v1168_v23, 256 }
 0x351   : > { %2220 = vmatprep.subr.bf16.mxu1 %v2490_v17 }
 0x353   : > { %2221 = vmatpush3.bf16.msra.mxu1 %v2366_v32 }
 0x354   : > { %1192 = vbcast.lane.b32.xlu1 %v1190_v6, 256  ;;  %1196 = vbcast.lane.b32.xlu0 %v1190_v6, 264 }
 0x355   : > { %2222 = vmatprep.subr.bf16.mxu1 %v2490_v17 }
 0x357   : > { %2223 = vmatpush3.bf16.msra.mxu1 %v2368_v38 }
 0x358   : > { %1203 = vbcast.lane.b32.xlu1 %v1201_v25, 256  ;;  %1207 = vbcast.lane.b32.xlu0 %v1201_v25, 264 }
 0x359   : > { %2224 = vmatprep.subr.bf16.mxu1 %v2490_v17 }
 0x35b   : > { %2225 = vmatpush3.bf16.msra.mxu1 %v2369_v42 }
 0x35c   : > { %1214 = vbcast.lane.b32.xlu1 %v1212_v28, 256  ;;  %1218 = vbcast.lane.b32.xlu0 %v1212_v28, 264 }
 0x35d   : > { %2226 = vmatprep.subr.bf16.mxu1 %v2490_v17 }
 0x35f   : > { %2227 = vmatpush3.bf16.msra.mxu1 %v2370_v50 }
 0x360   : > { %1225 = vbcast.lane.b32.xlu1 %v1223_v46, 256  ;;  %1229 = vbcast.lane.b32.xlu0 %v1223_v46, 264 }
 0x361   : > { %2228 = vmatprep.subr.bf16.mxu1 %v2490_v17 }
 0x363   : > { %2229 = vmatpush3.bf16.msra.mxu1 %v2371_v62 }
 0x364   : > { %1236 = vbcast.lane.b32.xlu1 %v1234_v31, 256  ;;  %1240 = vbcast.lane.b32.xlu0 %v1234_v31, 264 }
 0x368   : > { %1247 = vbcast.lane.b32.xlu1 %v1245_v34, 256  ;;  %1251 = vbcast.lane.b32.xlu0 %v1245_v34, 264 }
 0x3a1   : > { %v1441_v39 = vpop.permute.xlu1 %1440  ;;  %v1434_v41 = vpop.permute.xlu0 %1433 }
 0x3a2   : > { %v1485_v47 = vmul.f32 %v1441_v39, %v2803_v56  ;;  %v1484_v48 = vmul.f32 %v1434_v41, %v2775_v35 }
 0x3a4   : > { %v1498_v61 = vrot.slane %v1485_v47, 4  ;;  %v1492_v53 = vrot.slane %v1484_v48, 4 }
 0x3a5   : > { %v1448_v54 = vpop.permute.xlu1 %1447  ;;  %v1462_v55 = vpop.permute.xlu0 %1461 }
 0x3a6   : > { %v1499_v57 = vadd.f32 %v1498_v61, %v1485_v47  ;;  %v1493_v58 = vadd.f32 %v1492_v53, %v1484_v48  ;;  %v1486_v1 = vmul.f32 %v1448_v54, %v2795_v51  ;;  %v1488_v2 = vmul.f32 %v1462_v55, %v2817_v0 }
 0x3a8   : > { %v1500_v4 = vrot.slane %v1499_v57, 2  ;;  %v1494_v7 = vrot.slane %v1493_v58, 2  ;;  %v1504_v9 = vrot.slane %v1486_v1, 4  ;;  %v1516_v37 = vrot.slane %v1488_v2, 4 }
 0x3a9   : > { %v1455_v12 = vpop.permute.xlu1 %1454  ;;  %v1476_v13 = vpop.permute.xlu0 %1475 }
 0x3aa   : > { %v1501_v15 = vadd.f32 %v1500_v4, %v1499_v57  ;;  %v1495_v56 = vadd.f32 %v1494_v7, %v1493_v58  ;;  %v1505_v18 = vadd.f32 %v1504_v9, %v1486_v1  ;;  %v1517_v35 = vadd.f32 %v1516_v37, %v1488_v2 }
 0x3ab   : > { %v1487_v20 = vmul.f32 %v1455_v12, %v2809_v59  ;;  %v1490_v21 = vmul.f32 %v1476_v13, %v2831_v8 }
 0x3ac   : > { %v1502_v63 = vrot.slane %v1501_v15, 1  ;;  %v1496_v60 = vrot.slane %v1495_v56, 1  ;;  %v1506_v23 = vrot.slane %v1505_v18, 2  ;;  %v1518_v51 = vrot.slane %v1517_v35, 2 }
 0x3ad   : > { %v1510_v6 = vrot.slane %v1487_v20, 4  ;;  %v1528_v0 = vrot.slane %v1490_v21, 4  ;;  %v1469_v25 = vpop.permute.xlu1 %1468 }
 0x3ae   : > { %v1503_v26 = vadd.f32 %v1502_v63, %v1501_v15  ;;  %v1497_v28 = vadd.f32 %v1496_v60, %v1495_v56  ;;  %v1507_v43 = vadd.f32 %v1506_v23, %v1505_v18  ;;  %v1519_v46 = vadd.f32 %v1518_v51, %v1517_v35 }
 0x3af   : > { %v1511_v5 = vadd.f32 %v1510_v6, %v1487_v20  ;;  %v1529_v31 = vadd.f32 %v1528_v0, %v1490_v21  ;;  %v1489_v32 = vmul.f32 %v1469_v25, %v2823_v3 }
 0x3b0   : > { %v1508_v34 = vrot.slane %v1507_v43, 1  ;;  %v1565_v50 = vpack.c.bf16 %v1503_v26, %v1503_v26  ;;  %v1564_v62 = vpack.c.bf16 %v1497_v28, %v1497_v28  ;;  %v1520_v41 = vrot.slane %v1519_v46, 1 }
 0x3b1   : > { %v1512_v38 = vrot.slane %v1511_v5, 2  ;;  %v1530_v59 = vrot.slane %v1529_v31, 2  ;;  %v1522_v42 = vrot.slane %v1489_v32, 4  ;;  %v1483_v8 = vpop.permute.xlu1 %1482 }
 0x3b2   : > { %v1509_v39 = vadd.f32 %v1508_v34, %v1507_v43  ;;  %v1491_v53 = vmul.f32 %v1483_v8, %v2837_v10  ;;  %v1597_v1 = vunpack.c.l.b16 %v1565_v50  ;;  %v1521_v3 = vadd.f32 %v1520_v41, %v1519_v46 }
 0x3b3   : > { %v1513_v47 = vadd.f32 %v1512_v38, %v1511_v5  ;;  %v1531_v48 = vadd.f32 %v1530_v59, %v1529_v31  ;;  %v1523_v61 = vadd.f32 %v1522_v42, %v1489_v32  ;;  %v1596_v4 = vunpack.c.l.b16 %v1564_v62 }
 0x3b4   : > { %v1566_v54 = vpack.c.bf16 %v1509_v39, %v1509_v39  ;;  %v1534_v58 = vrot.slane %v1491_v53, 4  ;;  %v1568_v18 = vpack.c.bf16 %v1521_v3, %v1521_v3 }
 0x3b5   : > { %v1514_v55 = vrot.slane %v1513_v47, 1  ;;  %v1524_v57 = vrot.slane %v1523_v61, 2  ;;  %v1532_v2 = vrot.slane %v1531_v48, 1  ;;  %v1604_v20 = vsel %vm1137_vm3, %v1597_v1, %v1596_v4  ;;  %v2357_v1 = vld [vmem:[%s3240_s10 + $0x88] sm:$0xff]  }
 0x3b6   : > { %v1535_v37 = vadd.f32 %v1534_v58, %v1491_v53  ;;  %v1598_v12 = vunpack.c.l.b16 %v1566_v54  ;;  %v1600_v0 = vunpack.c.l.b16 %v1568_v18 }
 0x3b7   : > { %v1515_v7 = vadd.f32 %v1514_v55, %v1513_v47  ;;  %v1525_v9 = vadd.f32 %v1524_v57, %v1523_v61  ;;  %v1533_v35 = vadd.f32 %v1532_v2, %v1531_v48 }
 0x3b8   : > { %v1536_v56 = vrot.slane %v1535_v37, 2  ;;  %v1605_v60 = vsel %vm1139_vm4, %v1598_v12, %v1604_v20 }
 0x3b9   : > { %v1567_v13 = vpack.c.bf16 %v1515_v7, %v1515_v7  ;;  %v1526_v15 = vrot.slane %v1525_v9, 1  ;;  %v1570_v25 = vpack.c.bf16 %v1533_v35, %v1533_v35 }
 0x3ba   : > { %v1537_v63 = vadd.f32 %v1536_v56, %v1535_v37 }
 0x3bb   : > { %v1599_v10 = vunpack.c.l.b16 %v1567_v13  ;;  %v1527_v21 = vadd.f32 %v1526_v15, %v1525_v9  ;;  %v1602_v59 = vunpack.c.l.b16 %v1570_v25  ;;  %v2358_v13 = vld [vmem:[%s3240_s10 + $0x90] sm:$0xff]  }
 0x3bc   : > { %v1538_v6 = vrot.slane %v1537_v63, 1 }
 0x3bd   : > { %v1606_v23 = vsel %vm1141_vm5, %v1599_v10, %v1605_v60  ;;  %v1569_v51 = vpack.c.bf16 %v1527_v21, %v1527_v21  ;;  %v2359_v60 = vld [vmem:[%s3240_s10 + $0x98] sm:$0xff]  }
 0x3be   : > { %v1186_v26 = vpop.permute.xlu1 %1185  ;;  %v1175_v28 = vpop.permute.xlu0 %1174  ;;  %v1539_v46 = vadd.f32 %v1538_v6, %v1537_v63  ;;  %v1607_v5 = vsel %vm1143_vm6, %v1600_v0, %v1606_v23 }
 0x3bf   : > { %v1601_v43 = vunpack.c.l.b16 %v1569_v51  ;;  %v1256_v34 = vmul.f32 %v1186_v26, %v2842_v11  ;;  %v1254_v38 = vmul.f32 %v1175_v28, %v2780_v36  ;;  %v2356_v36 = vld [vmem:[%s3240_s10 + $0x80] sm:$0xff]  }
 0x3c0   : > { %v1571_v32 = vpack.c.bf16 %v1539_v46, %v1539_v46 }
 0x3c1   : > { %v1608_v31 = vsel %vm1145_vm7, %v1601_v43, %v1607_v5  ;;  %v1277_v47 = vsel %vm1005_vm2, %v1256_v34, 0.0  ;;  %v1269_v48 = vsel %vm1005_vm2, %v1254_v38, 0.0 }
 0x3c2   : > { %v1182_v42 = vpop.permute.xlu1 %1181  ;;  %v1171_v8 = vpop.permute.xlu0 %1170  ;;  %v1603_v50 = vunpack.c.l.b16 %v1571_v32  ;;  %v1609_v41 = vsel %vm1147_vm8, %v1602_v59, %v1608_v31  ;;  %v2361_v31 = vld [vmem:[%s3240_s10 + $0xa0] sm:$0xff]  }
 0x3c3   : > { %v1255_v62 = vmul.f32 %v1182_v42, %v2849_v14  ;;  %v1253_v39 = vmul.f32 %v1171_v8, %v2788_v45 }
 0x3c4   : > { %v1610_v61 = vsel %vm1149_vm9, %v1603_v50, %v1609_v41 }
 0x3c5   : > { %v1278_v11 = vadd.f32 %v1277_v47, %v1255_v62  ;;  %v1270_v53 = vadd.f32 %v1269_v48, %v1253_v39  ;;  %v1611_v57 = vpack.c.b16 %v1610_v61, %v1610_v61  ;;  %v2363_v48 = vld [vmem:[%s3240_s10 + $0xa8] sm:$0xff]  }
 0x3c6   : > { %v1193_v54 = vpop.permute.xlu1 %1192  ;;  %v1197_v55 = vpop.permute.xlu0 %1196 }
 0x3c7   : > { %v1257_v14 = vmul.f32 %v1193_v54, %v2861_v19  ;;  %v1258_v45 = vmul.f32 %v1197_v55, %v2855_v16  ;;  %2211 = vmatmul.mubr.bf16.vlgmr.msra.gmra.mrb[4].mxu0 %v1611_v57  ;;  %v1279_v3 = vrot.slane %v1278_v11, 4  ;;  %v1271_v2 = vrot.slane %v1270_v53, 4 }
 0x3c8   : > { %2235 = vmatpush3.bf16.msra.mxu0 %v2356_v36  ;;  %2250 = vmatprep.mubr.msk.bf16.mxu0 %vm2491_vm1, %v2490_v17 }
 0x3c9   : > { %v1285_v58 = vsel %vm1005_vm2, %v1258_v45, 0.0  ;;  %2236 = vmatprep.subr.bf16.mxu0 %v2490_v17  ;;  %v1280_v15 = vadd.f32 %v1279_v3, %v1278_v11  ;;  %v1272_v56 = vadd.f32 %v1271_v2, %v1270_v53 }
 0x3ca   : > { %v1286_v4 = vadd.f32 %v1285_v58, %v1257_v14  ;;  %v1204_v7 = vpop.permute.xlu1 %1203  ;;  %v1208_v19 = vpop.permute.xlu0 %1207 }
 0x3cb   : > { %v1259_v16 = vmul.f32 %v1204_v7, %v2874_v24  ;;  %v1260_v9 = vmul.f32 %v1208_v19, %v2868_v22  ;;  %v1281_v23 = vrot.slane %v1280_v15, 2  ;;  %v1273_v51 = vrot.slane %v1272_v56, 2 }
 0x3cc   : > { %v1287_v37 = vrot.slane %v1286_v4, 4  ;;  %2237 = vmatpush3.bf16.msra.mxu0 %v2357_v1 }
 0x3cd   : > { %v1293_v12 = vsel %vm1005_vm2, %v1260_v9, 0.0  ;;  %2238 = vmatprep.subr.bf16.mxu0 %v2490_v17  ;;  %v1282_v32 = vadd.f32 %v1281_v23, %v1280_v15  ;;  %v1274_v34 = vadd.f32 %v1273_v51, %v1272_v56 }
 0x3ce   : > { %v1294_v18 = vadd.f32 %v1293_v12, %v1259_v16  ;;  %v1215_v35 = vpop.permute.xlu1 %1214  ;;  %v1219_v20 = vpop.permute.xlu0 %1218  ;;  %v1288_v10 = vadd.f32 %v1287_v37, %v1286_v4  ;;  %v2365_v4 = vld [vmem:[%s3240_s10 + $0xb0] sm:$0xff]  }
 0x3cf   : > { %v1261_v24 = vmul.f32 %v1215_v35, %v2887_v29  ;;  %v1262_v22 = vmul.f32 %v1219_v20, %v2881_v27  ;;  %v1283_v61 = vrot.slane %v1282_v32, 1  ;;  %v1275_v36 = vrot.slane %v1274_v34, 1 }
 0x3d0   : > { %v1295_v21 = vrot.slane %v1294_v18, 4  ;;  %2239 = vmatpush3.bf16.msra.mxu0 %v2358_v13  ;;  %v1289_v28 = vrot.slane %v1288_v10, 2 }
 0x3d1   : > { %v1301_v63 = vsel %vm1005_vm2, %v1262_v22, 0.0  ;;  %2240 = vmatprep.subr.bf16.mxu0 %v2490_v17  ;;  %v1284_v7 = vadd.f32 %v1283_v61, %v1282_v32  ;;  %v1276_v19 = vadd.f32 %v1275_v36, %v1274_v34 }
 0x3d2   : > { %v1296_v6 = vadd.f32 %v1295_v21, %v1294_v18  ;;  %v1302_v0 = vadd.f32 %v1301_v63, %v1261_v24  ;;  %v1226_v25 = vpop.permute.xlu1 %1225  ;;  %v1230_v26 = vpop.permute.xlu0 %1229  ;;  %v2367_v18 = vld [vmem:[%s3240_s10 + $0xb8] sm:$0xff]  }
 0x3d3   : > { %v1263_v29 = vmul.f32 %v1226_v25, %v2900_v30  ;;  %v1264_v27 = vmul.f32 %v1230_v26, %v2894_v33  ;;  %v1290_v30 = vadd.f32 %v1289_v28, %v1288_v10  ;;  %v1541_v35 = vpack.c.bf16 %v1284_v7, %v1284_v7 }
 0x3d4   : > { %v1297_v43 = vrot.slane %v1296_v6, 2  ;;  %v1303_v46 = vrot.slane %v1302_v0, 4  ;;  %2241 = vmatpush3.bf16.msra.mxu0 %v2359_v60  ;;  %v1540_v20 = vpack.c.bf16 %v1276_v19, %v1276_v19 }
 0x3d5   : > { %v1309_v5 = vsel %vm1005_vm2, %v1264_v27, 0.0  ;;  %2242 = vmatprep.subr.bf16.mxu0 %v2490_v17  ;;  %v1291_v55 = vrot.slane %v1290_v30, 1  ;;  %v1710_v25 = vunpack.c.l.b16 %v1541_v35 }
 0x3d6   : > { %v1304_v38 = vadd.f32 %v1303_v46, %v1302_v0  ;;  %v1310_v59 = vadd.f32 %v1309_v5, %v1263_v29  ;;  %v1237_v42 = vpop.permute.xlu1 %1236  ;;  %v1241_v8 = vpop.permute.xlu0 %1240  ;;  %v1298_v62 = vadd.f32 %v1297_v43, %v1296_v6  ;;  %v2392_v6 = vld [vmem:[#allocation2] sm:$0xff]  ;;  %v1709_v26 = vunpack.c.l.b16 %v1540_v20 }
 0x3d7   : > { %v1265_v33 = vmul.f32 %v1237_v42, %v2913_v44  ;;  %v1266_v50 = vmul.f32 %v1241_v8, %v2907_v40  ;;  %v1814_v0 = vpack.c.bf16 %v2392_v6, %v2392_v6 }
 0x3d8   : > { %v1305_v39 = vrot.slane %v1304_v38, 2  ;;  %v1311_v41 = vrot.slane %v1310_v59, 4  ;;  %2243 = vmatpush3.bf16.msra.mxu0 %v2361_v31  ;;  %v1299_v45 = vrot.slane %v1298_v62, 1  ;;  %v1717_v32 = vsel %vm1137_vm3, %v1710_v25, %v1709_v26 }
 0x3d9   : > { %v1317_v47 = vsel %vm1005_vm2, %v1266_v50, 0.0  ;;  %2244 = vmatprep.subr.bf16.mxu0 %v2490_v17 }
 0x3da   : > { %v1306_v11 = vadd.f32 %v1305_v39, %v1304_v38  ;;  %v1312_v53 = vadd.f32 %v1311_v41, %v1310_v59  ;;  %v1248_v54 = vpop.permute.xlu1 %1247  ;;  %v1252_v44 = vpop.permute.xlu0 %1251  ;;  %v1318_v40 = vadd.f32 %v1317_v47, %v1265_v33 }
 0x3db   : > { %v1267_v57 = vmul.f32 %v1248_v54, %v2926_v52  ;;  %v1268_v14 = vmul.f32 %v1252_v44, %v2920_v49  ;;  %v1292_v52 = vadd.f32 %v1291_v55, %v1290_v30  ;;  %v1300_v49 = vadd.f32 %v1299_v45, %v1298_v62 }
 0x3dc   : > { %v1313_v58 = vrot.slane %v1312_v53, 2  ;;  %v1307_v1 = vrot.slane %v1306_v11, 1  ;;  %v1319_v3 = vrot.slane %v1318_v40, 4  ;;  %2245 = vmatpush3.bf16.msra.mxu0 %v2363_v48 }
 0x3dd   : > { %v1325_v2 = vsel %vm1005_vm2, %v1268_v14, 0.0  ;;  %2246 = vmatprep.subr.bf16.mxu0 %v2490_v17  ;;  %v1542_v22 = vpack.c.bf16 %v1292_v52, %v1292_v52  ;;  %v1543_v63 = vpack.c.bf16 %v1300_v49, %v1300_v49 }
 0x3de   : > { %v1314_v16 = vadd.f32 %v1313_v58, %v1312_v53  ;;  %v1326_v9 = vadd.f32 %v1325_v2, %v1267_v57  ;;  %v1320_v37 = vadd.f32 %v1319_v3, %v1318_v40  ;;  %v1308_v15 = vadd.f32 %v1307_v1, %v1306_v11 }
 0x3df   : > { %v1711_v27 = vunpack.c.l.b16 %v1542_v22  ;;  %v1712_v46 = vunpack.c.l.b16 %v1543_v63 }
 0x3e0   : > { %v1315_v12 = vrot.slane %v1314_v16, 1  ;;  %v1327_v13 = vrot.slane %v1326_v9, 4  ;;  %v1321_v56 = vrot.slane %v1320_v37, 2  ;;  %2247 = vmatpush3.bf16.msra.mxu0 %v2365_v4  ;;  %v1544_v23 = vpack.c.bf16 %v1308_v15, %v1308_v15 }
 0x3e1   : > { %2248 = vmatprep.subr.bf16.mxu0 %v2490_v17  ;;  %v1718_v59 = vsel %vm1139_vm4, %v1711_v27, %v1717_v32 }
 0x3e2   : > { %v1316_v10 = vadd.f32 %v1315_v12, %v1314_v16  ;;  %v1328_v24 = vadd.f32 %v1327_v13, %v1326_v9  ;;  %v1322_v21 = vadd.f32 %v1321_v56, %v1320_v37  ;;  %v1713_v31 = vunpack.c.l.b16 %v1544_v23 }
 0x3e3   : > { %v1719_v8 = vsel %vm1141_vm5, %v1712_v46, %v1718_v59 }
 0x3e4   : > { %v1329_v60 = vrot.slane %v1328_v24, 2  ;;  %v1323_v51 = vrot.slane %v1322_v21, 1  ;;  %2249 = vmatpush3.bf16.msra.mxu0 %v2367_v18  ;;  %v1545_v28 = vpack.c.bf16 %v1316_v10, %v1316_v10  ;;  %v1720_v33 = vsel %vm1143_vm6, %v1713_v31, %v1719_v8 }
 0x3e6   : > { %v1330_v29 = vadd.f32 %v1329_v60, %v1328_v24  ;;  %v1324_v43 = vadd.f32 %v1323_v51, %v1322_v21  ;;  %v1714_v34 = vunpack.c.l.b16 %v1545_v28 }
 0x3e7   : > { %2251 = vmatmul.mubr.bf16.vlgmr.msra.gmra.mrb[8].mxu0 %v1814_v0 }
 0x3e8   : > { %v1331_v5 = vrot.slane %v1330_v29, 1  ;;  %v1546_v17 = vpack.c.bf16 %v1324_v43, %v1324_v43  ;;  %v1721_v62 = vsel %vm1145_vm7, %v1714_v34, %v1720_v33 }
 0x3ea   : > { %v1332_v38 = vadd.f32 %v1331_v5, %v1330_v29  ;;  %v1715_v42 = vunpack.c.l.b16 %v1546_v17 }
 0x3ec   : > { %v1547_v30 = vpack.c.bf16 %v1332_v38, %v1332_v38  ;;  %v1722_v39 = vsel %vm1147_vm8, %v1715_v42, %v1721_v62 }
 0x3ee   : > { %v1716_v50 = vunpack.c.l.b16 %v1547_v30 }
 0x3f0   : > { %v1723_v41 = vsel %vm1149_vm9, %v1716_v50, %v1722_v39 }
 0x3f1   : > { %v1724_v47 = vpack.c.b16 %v1723_v41, %v1723_v41 }
 0x3f3   : > { %2231 = vmatmul.mubr.bf16.vlgmr.msra.gmra.mrb[12].mxu1 %v1724_v47 }
 0x3f4   : > { %2406 = shalt.err (!%p2403_p4)
}
 0x3f5   : > { %s2407_s17 = scalar_lea.hbm %s3156_s21, 128  ;;  %s2411_s24 = scalar_lea.hbm %s3243_s13, 768 }
 0x3f6   : > { %p2408_p7 = scmp.ne.s32.totalorder %s3156_s21, %s2407_s17  ;;  %p2412_p10 = scmp.lt.u32.totalorder %s3156_s21, %s3243_s13 }
 0x3f7   : > { %p2413_p11 = scmp.lt.u32.totalorder %s2411_s24, %s2407_s17  ;;  %p2415_p13 = scmp.lt.u32.totalorder %s2407_s17, %s3156_s21 }
 0x3f8   : > { %p2409_p8 = pnand %p2408_p7, %p2603_p5 }
 0x3f9   : > { %p2414_p12 = por %p2413_p11, %p2412_p10 }
 0x3fa   : > { %p2410_p9 = pneg %p2409_p8 }
 0x3fb   : > { %p2416_p0 = por %p2415_p13, %p2414_p12 }
 0x3fd   : > { %p2417_p1 = pnand %p2416_p0, %p2410_p9 }
 0x3ff   : > { %2420 = shalt.err (!%p2417_p1)
}
 0x400   : > { %2261 = dma.vmem_to_hbm [thread:$0]  (%p2603_p5), %s1964_s23, 128, %s3156_s21, %s1937_s27   ;;  %v2120_v45 = vld [vmem:[%s3241_s11] ss:$0 sm:$0xff] }
 0x401   : > { %s1950_s21 = sshll.u32 %s2622_s16, 4  ;;  %s3186_s17 = scalar_lea.hbm %s3242_s12, %s2123_s22  ;;  %s3188_s21 = int_to_ptr.vmem [resolvable:$true] %s1950_s21 }
 0x402   : > { %s1932_s19 = scalar_lea.sflag [#allocation4], %s2614_s20  ;;  %s2421_s0 = scalar_lea.vmem %s3188_s21, 128 }
 0x403   : > { %p2422_p2 = scmp.ne.s32.totalorder %s3188_s21, %s2421_s0  ;;  %s2494_s24 = smov [#allocation3]  }
 0x404   : > { %s2425_s29 = sshll.u32 %s2494_s24, 4  ;;  %s2426_s29 = int_to_ptr.vmem [resolvable:$false] %s2425_s29 }
 0x405   : > { %p2423_p3 = pnand %p2422_p2, %p2603_p5  ;;  %s2427_s15 = scalar_lea.vmem %s2426_s29, 256 }
 0x406   : > { %p2428_p7 = scmp.lt.s32.totalorder %s3188_s21, %s2426_s29  ;;  %p2429_p8 = scmp.lt.s32.totalorder %s2427_s15, %s2421_s0 }
 0x407   : > { %p2424_p4 = pneg %p2423_p3 }
 0x408   : > { %p2430_p9 = por %p2429_p8, %p2428_p7 }
 0x40a   : > { %p2431_p10 = pnand %p2430_p9, %p2424_p4 }
 0x49a   : > { %v1695_v48 = vpop.f32.mrb[4].mxu0 }
 0x49b   : > { %v2212_v61 = vpop.f32.mrb[5].mxu0 }
 0x49c   : > { %v1698_v36 = vpop.f32.mrb[6].mxu0 }
 0x49d   : > { %v2213_v11 = vpop.f32.mrb[7].mxu0 }
 0x4ba   : > { %v1913_v53 = vpop.f32.mrb[8].mxu0 }
 0x4bb   : > { %v2252_v54 = vpop.f32.mrb[9].mxu0 }
 0x4bc   : > { %v1916_v44 = vpop.f32.mrb[10].mxu0 }
 0x4bd   : > { %v2253_v55 = vpop.f32.mrb[11].mxu0 }
 0x4c6   : > { %v1808_v40 = vpop.f32.mrb[12].mxu1 }
 0x4c7   : > { %v1809_v57 = vadd.f32 %v1808_v40, %v1695_v48  ;;  %v2232_v14 = vpop.f32.mrb[13].mxu1 }
 0x4c8   : > { %v1811_v58 = vpop.f32.mrb[14].mxu1 }
 0x4c9   : > { %v1919_v1 = vadd.f32 %v1913_v53, %v1809_v57  ;;  %v2233_v3 = vpop.f32.mrb[15].mxu1 }
 0x4cb   : > { %v1927_v2 = vadd.f32 %v2120_v45, %v1919_v1 }
 0x4cd   : > { %2390 = vtanh.f32 %v1927_v2 }
 0x4d7   : > { %v2391_v4 = vpop.eup %2390 }
 0x4d8   : > { %1929 = vst [vmem:[%s2622_s16] sm:$0xff] %v2391_v4 }
 0x4d9   : > { %2434 = shalt.err (!%p2431_p10)
}
 0x4da   : > { %s2435_s20 = scalar_lea.hbm %s3186_s17, 128  ;;  %s2439_s30 = scalar_lea.hbm %s3242_s12, 768 }
 0x4db   : > { %p2436_p11 = scmp.ne.s32.totalorder %s3186_s17, %s2435_s20  ;;  %p2440_p0 = scmp.lt.u32.totalorder %s3186_s17, %s3242_s12 }
 0x4dc   : > { %p2441_p1 = scmp.lt.u32.totalorder %s2439_s30, %s2435_s20  ;;  %p2443_p3 = scmp.lt.u32.totalorder %s2435_s20, %s3186_s17 }
 0x4dd   : > { %p2437_p12 = pnand %p2436_p11, %p2603_p5 }
 0x4de   : > { %p2442_p2 = por %p2441_p1, %p2440_p0 }
 0x4df   : > { %p2438_p13 = pneg %p2437_p12 }
 0x4e0   : > { %p2444_p4 = por %p2443_p3, %p2442_p2 }
 0x4e2   : > { %p2445_p7 = pnand %p2444_p4, %p2438_p13 }
 0x4e4   : > { %2448 = shalt.err (!%p2445_p7)
}
 0x4e5   : > { %2260 = dma.vmem_to_hbm [thread:$0]  (%p2603_p5), %s3188_s21, 128, %s3186_s17, %s1932_s19  }
 0x4e6 PF: > { %p2271_p8 = scmp.ge.s32.totalorder %s2487_s28, 2  ;;  %s1975_s27 = sand.u32 1, %s2475_s25  }
 0x4e7   : > { %s1976_s0 = scalar_lea.sflag [#allocation4], %s1975_s27 }
 0x4e8   : > { %p2265_p9 = pnand %p2271_p8, %p2607_p6 }
 0x4ea   : > { %2466 = dma.done.wait (!%p2265_p9), %s1976_s0, 128  }
 0x4eb   : > { %2468 = vsyncadd (!%p2265_p9), %s1976_s0, 4294967168  ;;  %s1985_s24 = scalar_lea.sflag [#allocation6], %s1975_s27 }
 0x4ec   : > { %2470 = dma.done.wait (!%p2265_p9), %s1985_s24, 128  }
 0x4ed   : > { %2472 = vsyncadd (!%p2265_p9), %s1985_s24, 4294967168  ;;  %s3259_s28 = sld [smem:[#allocation11_spill]]  ;;  %s3260_s25 = sld [smem:[#allocation9_spill]] }
 0x4ee   : > { %s3261_s26 = sld [smem:[#allocation10_spill]]  ;;  %s3262_s27 = sld [smem:[#allocation12_spill]] }
 0x4f3   : > { %p27_p5 = scmp.ge.s32.totalorder %s3259_s28, 8  }
 0x4f5   :  { %29 = sbr.rel (!%p27_p5) target bundleno = 7 (0x7), region = 124 }
 0x4fc   :  { %1990 = vsyncpa [#allocation4], 1 }
 0x4fd   :  { %1992 = vsyncpa [#allocation4 + $0x1], 1 }
 0x4fe   :  { %1993 = vsyncpa [#allocation6], 1 }
 0x4ff   :  { %1995 = vsyncpa [#allocation6 + $0x1], 1 }

</bundles_post_ra>
